<compile_context>
chip_gen: v5e
topology: v5e:2x2
jax: 0.10.0
libtpu: 0.0.40
codegen_flags: <defaults>
</compile_context>

<pallas_src>
import functools

import jax
import jax.numpy as jnp
from jax.experimental import pallas as pl
from jax.experimental.pallas import tpu as pltpu

TEMPERATURE = 0.1
_NEG_PAD = -1e30  # padded rows: pos=0, neg=-1e30  =>  loss contribution == 0


def _contrastive_loss_kernel(pos_ref, neg_ref, out_ref, *, inv_t):
    """One row-tile of CE(label=0) over the virtual [pos | neg] logits.

    Writes this tile's partial loss sum broadcast over a (1, 8, 128)
    lane/sublane-dense output block; no cross-iteration carry, so the grid
    axis is 'parallel'. The mean is finished in plain JAX in the wrapper.
    """
    i = pl.program_id(0)
    tile_n = neg_ref.shape[0]

    # pos is resident in VMEM (single DMA for the whole call); slice our rows.
    row0 = pl.multiple_of(i * tile_n, tile_n)
    pos = pos_ref[pl.ds(row0, tile_n), :].astype(jnp.float32)      # (tile_n, 1)
    neg = neg_ref[...].astype(jnp.float32)                         # (tile_n, K)

    # Numerically-stable logsumexp over the virtual concat [pos | neg].
    # The 1/temperature scale is folded into the single (x - m) * inv_t that
    # feeds the exp, so exactly one sub + one mul per element hit the VPU
    # before the EUP exp.
    m = jnp.maximum(pos, jnp.max(neg, axis=1, keepdims=True))      # (tile_n, 1)
    sum_exp = jnp.exp((pos - m) * inv_t) + jnp.sum(
        jnp.exp((neg - m) * inv_t), axis=1, keepdims=True)         # (tile_n, 1)
    # CE with label 0: logsumexp(logits) - logits[:, 0]
    loss = jnp.log(sum_exp) + (m - pos) * inv_t                    # (tile_n, 1)

    partial = jnp.sum(loss)                                        # f32 scalar
    out_ref[...] = jnp.full(out_ref.shape, partial, dtype=jnp.float32)


def _round_up(x, m):
    return (x + m - 1) // m * m


def contrastive_head_loss(pos, neg, *, temperature=TEMPERATURE, tile_n=None,
                          target_block_bytes=2 * 1024 * 1024):
    """Returns {'loss': scalar} matching ContrastiveHead.forward.

    pos: (N, 1) similarities, neg: (N, K) similarities (f32 or bf16 — feed
    bf16 if the producer can, it halves HBM traffic on this mem-bound kernel).
    """
    N, one = pos.shape
    assert one == 1
    n2, K = neg.shape
    assert n2 == N

    # Row tile sized so the neg block is ~target_block_bytes (double-buffered
    # by Pallas). Multiple of 8 (sublane), capped at 4096 rows and at the
    # (8-rounded) problem size.
    itemsize = jnp.dtype(neg.dtype).itemsize
    if tile_n is None:
        tile_n = max(8, target_block_bytes // (K * itemsize))
        tile_n = min(tile_n, 4096)
    tile_n = max(8, tile_n - tile_n % 8)
    tile_n = min(tile_n, _round_up(N, 8))

    num_tiles = pl.cdiv(N, tile_n)
    n_pad = num_tiles * tile_n

    # Pad ragged N with rows that contribute exactly zero loss.
    if n_pad != N:
        pos = jnp.pad(pos, ((0, n_pad - N), (0, 0)))                       # pos -> 0
        neg = jnp.pad(neg, ((0, n_pad - N), (0, 0)), constant_values=_NEG_PAD)

    kernel = functools.partial(_contrastive_loss_kernel,
                               inv_t=float(1.0 / temperature))

    partials = pl.pallas_call(
        kernel,
        out_shape=jax.ShapeDtypeStruct((num_tiles, 8, 128), jnp.float32),
        grid_spec=pltpu.PrefetchScalarGridSpec(
            num_scalar_prefetch=0,
            grid=(num_tiles,),
            in_specs=[
                # pos: whole column resident in VMEM (one DMA, sliced in-kernel).
                pl.BlockSpec((n_pad, 1), lambda i: (0, 0)),
                # neg: streamed row tiles, lane-dense (last dim = full K).
                pl.BlockSpec((tile_n, K), lambda i: (i, 0)),
            ],
            out_specs=pl.BlockSpec((1, 8, 128), lambda i: (i, 0, 0)),
        ),
        compiler_params=pltpu.CompilerParams(
            dimension_semantics=("parallel",),       # no carry -> dual-TC on v7x
            vmem_limit_bytes=32 * 1024 * 1024,
        ),
    )(pos, neg)

    # Padded rows contributed exactly 0, so divide by the true N.
    loss = jnp.sum(partials[:, 0, 0]) / jnp.float32(N)
    return {"loss": loss}


def _reference_loss(pos, neg, temperature=TEMPERATURE):
    logits = jnp.concatenate([pos, neg], axis=1).astype(jnp.float32) / temperature
    lse = jax.scipy.special.logsumexp(logits, axis=1)
    return jnp.mean(lse - logits[:, 0])


if __name__ == "__main__":
    key = jax.random.PRNGKey(0)
    kp, kn = jax.random.split(key)
    N, K = 300, 256  # odd N exercises the padding path
    # Similarities in roughly [-1, 1], like normalized-feature dot products.
    # Fed as bf16 (as an upstream producer would) to halve HBM traffic.
    pos = jax.random.uniform(kp, (N, 1), jnp.float32, minval=-1.0, maxval=1.0
                             ).astype(jnp.bfloat16)
    neg = jax.random.uniform(kn, (N, K), jnp.float32, minval=-1.0, maxval=1.0
                             ).astype(jnp.bfloat16)

    ref = _reference_loss(pos, neg)

    # Auto-sized tile (single large tile at this small N).
    loss_auto = jax.block_until_ready(contrastive_head_loss(pos, neg)["loss"])
    # Forced multi-tile path (exercises parallel grid + ragged padding).
    loss_tiled = jax.block_until_ready(
        contrastive_head_loss(pos, neg, tile_n=128)["loss"])

    assert jnp.allclose(loss_auto, ref, rtol=1e-4, atol=1e-4), (loss_auto, ref)
    assert jnp.allclose(loss_tiled, ref, rtol=1e-4, atol=1e-4), (loss_tiled, ref)

    # TODO(synk): pos_nn_num / neg_fn_num (top-k) / neg_th_value branches are
    # config-off by default and not implemented in the kernel.
    print("KERNEL_OK")
</pallas_src>

<mosaic_0001>
module attributes {stable_mosaic.version = 11 : i64} {
  func.func @_contrastive_loss_kernel(%arg0: i32, %arg1: memref<304x1xbf16, #tpu.memory_space<vmem>>, %arg2: memref<304x256xbf16, #tpu.memory_space<vmem>>, %arg3: memref<1x8x128xf32, #tpu.memory_space<vmem>>) attributes {dimension_semantics = [#tpu.dimension_semantics<parallel>], iteration_bounds = array<i64: 1>, scalar_prefetch = 0 : i64, scratch_operands = 0 : i64, tpu.core_type = #tpu.core_type<tc>, window_params = [{pipeline_mode = #tpu.pipeline_mode<synchronous>, transform_indices = @transform_0, window_bounds = array<i64: 304, 1>}, {transform_indices = @transform_1, window_bounds = array<i64: 304, 256>}, {transform_indices = @transform_2, window_bounds = array<i64: 1, 8, 128>}]} {
    %c304_i32 = arith.constant 304 : i32
    %0 = arith.muli %arg0, %c304_i32 : i32
    %1 = tpu.assume_multiple %0, 304 : i32
    %2 = arith.index_cast %1 : i32 to index
    %c0 = arith.constant 0 : index
    %3 = vector.load %arg1[%2, %c0] : memref<304x1xbf16, #tpu.memory_space<vmem>>, vector<304x1xbf16>
    %4 = arith.extf %3 : vector<304x1xbf16> to vector<304x1xf32>
    %c0_0 = arith.constant 0 : index
    %c0_1 = arith.constant 0 : index
    %5 = vector.load %arg2[%c0_0, %c0_1] : memref<304x256xbf16, #tpu.memory_space<vmem>>, vector<304x256xbf16>
    %6 = arith.extf %5 : vector<304x256xbf16> to vector<304x256xf32>
    %cst = arith.constant dense<0xFF800000> : vector<304xf32>
    %7 = vector.multi_reduction <maximumf>, %6, %cst [1] : vector<304x256xf32> to vector<304xf32>
    %8 = vector.shape_cast %7 : vector<304xf32> to vector<304x1xf32>
    %9 = arith.maximumf %4, %8 : vector<304x1xf32>
    %10 = arith.subf %4, %9 : vector<304x1xf32>
    %cst_2 = arith.constant 1.000000e+01 : f32
    %11 = vector.broadcast %cst_2 : f32 to vector<304x1xf32>
    %12 = arith.mulf %10, %11 : vector<304x1xf32>
    %13 = math.exp %12 : vector<304x1xf32>
    %14 = vector.broadcast %9 : vector<304x1xf32> to vector<304x256xf32>
    %15 = arith.subf %6, %14 : vector<304x256xf32>
    %cst_3 = arith.constant 1.000000e+01 : f32
    %16 = vector.broadcast %cst_3 : f32 to vector<304x256xf32>
    %17 = arith.mulf %15, %16 : vector<304x256xf32>
    %18 = math.exp %17 : vector<304x256xf32>
    %cst_4 = arith.constant dense<0.000000e+00> : vector<304xf32>
    %19 = vector.multi_reduction <add>, %18, %cst_4 [1] : vector<304x256xf32> to vector<304xf32>
    %20 = vector.shape_cast %19 : vector<304xf32> to vector<304x1xf32>
    %21 = arith.addf %13, %20 : vector<304x1xf32>
    %22 = math.log %21 : vector<304x1xf32>
    %23 = arith.subf %9, %4 : vector<304x1xf32>
    %cst_5 = arith.constant 1.000000e+01 : f32
    %24 = vector.broadcast %cst_5 : f32 to vector<304x1xf32>
    %25 = arith.mulf %23, %24 : vector<304x1xf32>
    %26 = arith.addf %22, %25 : vector<304x1xf32>
    %27 = vector.shape_cast %26 : vector<304x1xf32> to vector<1x304x1xf32>
    %cst_6 = arith.constant dense<0.000000e+00> : vector<1xf32>
    %28 = vector.multi_reduction <add>, %27, %cst_6 [1, 2] : vector<1x304x1xf32> to vector<1xf32>
    %29 = vector.shape_cast %28 : vector<1xf32> to vector<1x1x1xf32>
    %30 = vector.extract %29[0, 0, 0] : f32 from vector<1x1x1xf32>
    %31 = vector.broadcast %30 : f32 to vector<1x8x128xf32>
    %c0_7 = arith.constant 0 : index
    %c0_8 = arith.constant 0 : index
    %c0_9 = arith.constant 0 : index
    %32 = vector.load %arg3[%c0_7, %c0_8, %c0_9] : memref<1x8x128xf32, #tpu.memory_space<vmem>>, vector<1x8x128xf32>
    tpu.vector_store %arg3[%c0_7, %c0_8, %c0_9], %31 {strides = array<i32>} : memref<1x8x128xf32, #tpu.memory_space<vmem>>, vector<1x8x128xf32>,
    return
  }
  func.func @transform_0(%arg0: i32) -> (i32, i32) {
    %c0_i32 = arith.constant 0 : i32
    %c0_i32_0 = arith.constant 0 : i32
    %c0_i32_1 = arith.constant 0 : i32
    return %c0_i32, %c0_i32_0 : i32, i32
  }
  func.func @transform_1(%arg0: i32) -> (i32, i32) {
    %c0_i32 = arith.constant 0 : i32
    %c0_i32_0 = arith.constant 0 : i32
    return %arg0, %c0_i32 : i32, i32
  }
  func.func @transform_2(%arg0: i32) -> (i32, i32, i32) {
    %c0_i32 = arith.constant 0 : i32
    %c0_i32_0 = arith.constant 0 : i32
    %c0_i32_1 = arith.constant 0 : i32
    return %arg0, %c0_i32, %c0_i32_0 : i32, i32, i32
  }
}

</mosaic_0001>

<bundles_post_ra>
// kernel: tpu_custom_call.1
= control target key start
LH: loop header
LB: loop body
LE: loop exit
PB: predicated region body
PF: predicated region fallthrough
CT: control target
= control target key end

     0   :  { %7 = vsyncpa [#allocation3], 0  ;;  %s3277_s0 = inlined_call_operand.vmem [shape: bf16[304,1], index: 0, kind: input, shape index: {}]   ;;  %s3278_s1 = inlined_call_operand.hbm [shape: bf16[304,256], index: 1, kind: input, shape index: {}]   ;;  %s3279_s2 = inlined_call_operand.hbm [shape: f32[1,8,128], index: 2, kind: output, shape index: {}]  }
   0x1   :  { %8 = vsyncpa [#allocation4], 0  ;;  %s15_s11 = sshll.u32 %s3278_s1, 4  ;;  %s2024_s12 = smov [#allocation2]   ;;  %s16_s11 = int_to_ptr.hbm [resolvable:$true] %s15_s11 }
   0x2   :  { %s17_s13 = sshll.u32 %s2024_s12, 4  ;;  %s2025_s14 = smov 128   ;;  %s18_s13 = int_to_ptr.vmem [resolvable:$true] %s17_s13 }
   0x3   :  { %s2026_s15 = smov 8  }
   0x4   :  { %23 = dma.hbm_to_vmem [thread:$0]  %s16_s11, 4864, %s18_s13, [#allocation3], %s2025_s14, %s2025_s14, %s2026_s15  }
   0x5   :  { %2020 = dma.done.wait [#allocation3], 4864  }
   0x6   :  { %2021 = vsyncadd [#allocation3], 4294962432  ;;  %v2047_v0 = vld [vmem:[#allocation2 + $0x20] sm:$0xff]  ;;  %v2049_v1 = vld [vmem:[#allocation2 + $0x10] sm:$0xff]  ;;  %vm1363_vm0 = vcmask 7168   ;;  %s1457_s25 = sshll.u32 %s3279_s2, 4  ;;  %s1458_s25 = int_to_ptr.hbm [resolvable:$true] %s1457_s25 }
   0x7   :  { %v2051_v2 = vld [vmem:[#allocation2] sm:$0xff]  ;;  %v3343_v3 = vunpack.c.l.bf16 %v2047_v0  ;;  %v3342_v4 = vunpack.c.h.bf16 %v2047_v0  ;;  %v3346_v5 = vunpack.c.l.bf16 %v2049_v1  ;;  %v3344_v6 = vunpack.c.h.bf16 %v2049_v1  ;;  %v2059_v9 = vld [vmem:[#allocation2 + $0x28] sm:$0xff]  ;;  %v2061_v10 = vld [vmem:[#allocation2 + $0x18] sm:$0xff]  ;;  %s2028_s26 = smov [#allocation5]  }
   0x8   :  { %v3355_v7 = vunpack.c.l.bf16 %v2051_v2  ;;  %v3354_v8 = vunpack.c.h.bf16 %v2051_v2  ;;  %v2071_v13 = vld [vmem:[#allocation2 + $0x8] sm:$0xff]  ;;  %v3329_v15 = vunpack.c.l.bf16 %v2059_v9  ;;  %v3328_v16 = vunpack.c.h.bf16 %v2059_v9  ;;  %v2095_v24 = vld [vmem:[#allocation2 + $0x40] sm:$0xff]  ;;  %v2097_v25 = vld [vmem:[#allocation2 + $0x38] sm:$0xff]  ;;  %s1455_s27 = sshll.u32 %s2028_s26, 4  ;;  %s1456_s27 = int_to_ptr.vmem [resolvable:$true] %s1455_s27 }
   0x9   :  { %v235_v11 = vmax.f32 %v3343_v3, %v3342_v4  ;;  %v229_v12 = vmax.f32 %v3346_v5, %v3344_v6  ;;  %v3348_v17 = vunpack.c.l.bf16 %v2061_v10  ;;  %v3347_v18 = vunpack.c.h.bf16 %v2061_v10  ;;  %v2099_v26 = vld [vmem:[#allocation2 + $0x30] sm:$0xff]  ;;  %v2119_v36 = vld [vmem:[#allocation2 + $0x58] sm:$0xff]  ;;  %v2123_v38 = vld [vmem:[#allocation2 + $0x48] sm:$0xff] }
   0xa   :  { %v223_v14 = vmax.f32 %v3355_v7, %v3354_v8  ;;  %v3353_v19 = vunpack.c.l.bf16 %v2071_v13  ;;  %v3352_v20 = vunpack.c.h.bf16 %v2071_v13  ;;  %v238_v21 = vmax.f32 %v3329_v15, %v3328_v16  ;;  %v2121_v37 = vld [vmem:[#allocation2 + $0x50] sm:$0xff]  ;;  %v2145_v49 = vld [vmem:[#allocation2 + $0x68] sm:$0xff]  ;;  %v2147_v50 = vld [vmem:[#allocation2 + $0x60] sm:$0xff] }
   0xb   :  { %236 = vmax.xlane.f32.xlu2 %v235_v11  ;;  %230 = vmax.xlane.f32.xlu1 %v229_v12  ;;  %v232_v22 = vmax.f32 %v3348_v17, %v3347_v18  ;;  %v3319_v27 = vunpack.c.l.bf16 %v2095_v24  ;;  %v3314_v28 = vunpack.c.h.bf16 %v2095_v24  ;;  %v3349_v29 = vunpack.c.l.bf16 %v2097_v25  ;;  %v2143_v48 = vld [vmem:[#allocation2 + $0x70] sm:$0xff]  ;;  %v2167_v60 = vld [vmem:[#allocation2 + $0x88] sm:$0xff]  ;;  %v2169_v61 = vld [vmem:[#allocation2 + $0x80] sm:$0xff] }
   0xc   :  { %224 = vmax.xlane.f32.xlu0 %v223_v14  ;;  %v226_v23 = vmax.f32 %v3353_v19, %v3352_v20  ;;  %v3345_v30 = vunpack.c.h.bf16 %v2097_v25  ;;  %v3351_v31 = vunpack.c.l.bf16 %v2099_v26  ;;  %v3350_v32 = vunpack.c.h.bf16 %v2099_v26  ;;  %v2171_v62 = vld [vmem:[#allocation2 + $0x78] sm:$0xff]  ;;  %v2337_v16 = vld [vmem:[#allocation2 + $0x120] sm:$0xff] }
   0xd   :  { %v247_v33 = vmax.f32 %v3319_v27, %v3314_v28  ;;  %v3305_v39 = vunpack.c.l.bf16 %v2119_v36  ;;  %v3302_v40 = vunpack.c.h.bf16 %v2119_v36  ;;  %v3323_v41 = vunpack.c.l.bf16 %v2121_v37  ;;  %v2313_v27 = vld [vmem:[#allocation2 + $0x110] sm:$0xff]  ;;  %3501 = vst [vmem:[#allocation9_spill] sm:$0xff] %v2337_v16 }
   0xe   :  { %v244_v34 = vmax.f32 %v3349_v29, %v3345_v30  ;;  %v241_v35 = vmax.f32 %v3351_v31, %v3350_v32  ;;  %v3320_v42 = vunpack.c.h.bf16 %v2121_v37  ;;  %v3341_v43 = vunpack.c.l.bf16 %v2123_v38 }
   0xf   :  { %v3340_v44 = vunpack.c.h.bf16 %v2123_v38  ;;  %v256_v45 = vmax.f32 %v3305_v39, %v3302_v40  ;;  %v3293_v51 = vunpack.c.l.bf16 %v2143_v48  ;;  %v3292_v52 = vunpack.c.h.bf16 %v2143_v48  ;;  %v2267_v40 = vld [vmem:[#allocation2 + $0xd8] sm:$0xff] }
  0x10   :  { %v253_v46 = vmax.f32 %v3323_v41, %v3320_v42  ;;  %v3311_v53 = vunpack.c.l.bf16 %v2145_v49  ;;  %v3310_v54 = vunpack.c.h.bf16 %v2145_v49  ;;  %v3281_v55 = vunpack.c.l.bf16 %v2147_v50  ;;  %v2315_v42 = vld [vmem:[#allocation2 + $0x108] sm:$0xff] }
  0x11   :  { %v250_v47 = vmax.f32 %v3341_v43, %v3340_v44  ;;  %v3280_v56 = vunpack.c.h.bf16 %v2147_v50  ;;  %v265_v57 = vmax.f32 %v3293_v51, %v3292_v52  ;;  %v3287_v63 = vunpack.c.l.bf16 %v2167_v60  ;;  %v2241_v52 = vld [vmem:[#allocation2 + $0xc8] sm:$0xff]  ;;  %v2243_v51 = vld [vmem:[#allocation2 + $0xc0] sm:$0xff] }
  0x12   :  { %v262_v58 = vmax.f32 %v3311_v53, %v3310_v54  ;;  %v3284_v11 = vunpack.c.h.bf16 %v2167_v60  ;;  %v3283_v12 = vunpack.c.l.bf16 %v2169_v61  ;;  %v3282_v14 = vunpack.c.h.bf16 %v2169_v61  ;;  %v2289_v54 = vld [vmem:[#allocation2 + $0xf8] sm:$0xff]  ;;  %v2291_v53 = vld [vmem:[#allocation2 + $0xf0] sm:$0xff] }
  0x13   :  { %239 = vmax.xlane.f32.xlu2 %v238_v21  ;;  %233 = vmax.xlane.f32.xlu1 %v232_v22  ;;  %v259_v59 = vmax.f32 %v3281_v55, %v3280_v56  ;;  %v3301_v21 = vunpack.c.l.bf16 %v2171_v62  ;;  %v3296_v22 = vunpack.c.h.bf16 %v2171_v62  ;;  %v3325_v28 = vunpack.c.l.bf16 %v2289_v54 }
  0x14   :  { %227 = vmax.xlane.f32.xlu0 %v226_v23  ;;  %v274_v23 = vmax.f32 %v3287_v63, %v3284_v11  ;;  %v2219_v11 = vld [vmem:[#allocation2 + $0xa8] sm:$0xff]  ;;  %v3333_v41 = vunpack.c.l.bf16 %v2313_v27 }
  0x1b   :  { %248 = vmax.xlane.f32.xlu2 %v247_v33  ;;  %245 = vmax.xlane.f32.xlu1 %v244_v34  ;;  %v271_v33 = vmax.f32 %v3283_v12, %v3282_v14  ;;  %v268_v34 = vmax.f32 %v3301_v21, %v3296_v22  ;;  %v2217_v12 = vld [vmem:[#allocation2 + $0xb0] sm:$0xff]  ;;  %v3307_v22 = vunpack.c.l.bf16 %v2241_v52  ;;  %v2265_v21 = vld [vmem:[#allocation2 + $0xe0] sm:$0xff] }
  0x1c   :  { %242 = vmax.xlane.f32.xlu0 %v241_v35  ;;  %v2191_v35 = vld [vmem:[#allocation2 + $0xa0] sm:$0xff]  ;;  %v3298_v63 = vunpack.c.l.bf16 %v2217_v12  ;;  %v3316_v39 = vunpack.c.l.bf16 %v2265_v21 }
  0x23   :  { %257 = vmax.xlane.f32.xlu2 %v256_v45  ;;  %254 = vmax.xlane.f32.xlu1 %v253_v46  ;;  %v2193_v45 = vld [vmem:[#allocation2 + $0x98] sm:$0xff]  ;;  %v2195_v46 = vld [vmem:[#allocation2 + $0x90] sm:$0xff] }
  0x24   :  { %251 = vmax.xlane.f32.xlu0 %v250_v47  ;;  %v3286_v47 = vunpack.c.l.bf16 %v2191_v35  ;;  %v3291_v56 = vunpack.c.l.bf16 %v2195_v46  ;;  %v3290_v55 = vunpack.c.h.bf16 %v2195_v46 }
  0x2b   :  { %266 = vmax.xlane.f32.xlu2 %v265_v57  ;;  %263 = vmax.xlane.f32.xlu1 %v262_v58  ;;  %v3285_v57 = vunpack.c.h.bf16 %v2191_v35  ;;  %v3289_v58 = vunpack.c.l.bf16 %v2193_v45 }
  0x2c   :  { %260 = vmax.xlane.f32.xlu0 %v259_v59  ;;  %v3288_v59 = vunpack.c.h.bf16 %v2193_v45 }
  0x2d   :  { %v283_v14 = vmax.f32 %v3286_v47, %v3285_v57 }
  0x33   :  { %275 = vmax.xlane.f32.xlu2 %v274_v23  ;;  %272 = vmax.xlane.f32.xlu1 %v271_v33  ;;  %v280_v23 = vmax.f32 %v3289_v58, %v3288_v59  ;;  %v277_v33 = vmax.f32 %v3291_v56, %v3290_v55  ;;  %v3297_v59 = vunpack.c.h.bf16 %v2217_v12  ;;  %v3300_v58 = vunpack.c.l.bf16 %v2219_v11 }
  0x34   :  { %269 = vmax.xlane.f32.xlu0 %v268_v34  ;;  %v2215_v34 = vld [vmem:[#allocation2 + $0xb8] sm:$0xff]  ;;  %v3299_v55 = vunpack.c.h.bf16 %v2219_v11 }
  0x35   :  { %v3295_v57 = vunpack.c.l.bf16 %v2215_v34  ;;  %v3294_v47 = vunpack.c.h.bf16 %v2215_v34 }
  0x37   :  { %v292_v56 = vmax.f32 %v3295_v57, %v3294_v47 }
  0x3b   :  { %284 = vmax.xlane.f32.xlu2 %v283_v14  ;;  %281 = vmax.xlane.f32.xlu1 %v280_v23  ;;  %v289_v14 = vmax.f32 %v3298_v63, %v3297_v59  ;;  %v286_v23 = vmax.f32 %v3300_v58, %v3299_v55  ;;  %v3306_v59 = vunpack.c.h.bf16 %v2241_v52  ;;  %v3309_v63 = vunpack.c.l.bf16 %v2243_v51 }
  0x3c   :  { %278 = vmax.xlane.f32.xlu0 %v277_v33  ;;  %v2239_v33 = vld [vmem:[#allocation2 + $0xd0] sm:$0xff]  ;;  %v3308_v55 = vunpack.c.h.bf16 %v2243_v51 }
  0x3d   :  { %v3304_v47 = vunpack.c.l.bf16 %v2239_v33  ;;  %v3303_v57 = vunpack.c.h.bf16 %v2239_v33 }
  0x3f   :  { %v301_v58 = vmax.f32 %v3304_v47, %v3303_v57 }
  0x43   :  { %293 = vmax.xlane.f32.xlu2 %v292_v56  ;;  %290 = vmax.xlane.f32.xlu1 %v289_v14  ;;  %v298_v56 = vmax.f32 %v3307_v22, %v3306_v59  ;;  %v295_v14 = vmax.f32 %v3309_v63, %v3308_v55  ;;  %v3315_v59 = vunpack.c.h.bf16 %v2265_v21  ;;  %v3318_v22 = vunpack.c.l.bf16 %v2267_v40 }
  0x44   :  { %287 = vmax.xlane.f32.xlu0 %v286_v23  ;;  %v2263_v23 = vld [vmem:[#allocation2 + $0xe8] sm:$0xff]  ;;  %v3317_v55 = vunpack.c.h.bf16 %v2267_v40 }
  0x45   :  { %v3313_v57 = vunpack.c.l.bf16 %v2263_v23  ;;  %v3312_v47 = vunpack.c.h.bf16 %v2263_v23 }
  0x47   :  { %v310_v63 = vmax.f32 %v3313_v57, %v3312_v47 }
  0x4b   :  { %302 = vmax.xlane.f32.xlu2 %v301_v58  ;;  %299 = vmax.xlane.f32.xlu1 %v298_v56  ;;  %v307_v58 = vmax.f32 %v3316_v39, %v3315_v59  ;;  %v304_v56 = vmax.f32 %v3318_v22, %v3317_v55  ;;  %v3324_v59 = vunpack.c.h.bf16 %v2289_v54  ;;  %v3327_v39 = vunpack.c.l.bf16 %v2291_v53 }
  0x4c   :  { %296 = vmax.xlane.f32.xlu0 %v295_v14  ;;  %v2287_v14 = vld [vmem:[#allocation2 + $0x100] sm:$0xff]  ;;  %v3326_v55 = vunpack.c.h.bf16 %v2291_v53 }
  0x4d   :  { %v3322_v47 = vunpack.c.l.bf16 %v2287_v14  ;;  %v3321_v57 = vunpack.c.h.bf16 %v2287_v14 }
  0x4f   :  { %v319_v22 = vmax.f32 %v3322_v47, %v3321_v57 }
  0x53   :  { %311 = vmax.xlane.f32.xlu2 %v310_v63  ;;  %308 = vmax.xlane.f32.xlu1 %v307_v58  ;;  %v316_v63 = vmax.f32 %v3325_v28, %v3324_v59  ;;  %v313_v58 = vmax.f32 %v3327_v39, %v3326_v55  ;;  %v3332_v59 = vunpack.c.h.bf16 %v2313_v27  ;;  %v3339_v28 = vunpack.c.l.bf16 %v2315_v42 }
  0x54   :  { %305 = vmax.xlane.f32.xlu0 %v304_v56  ;;  %v2311_v56 = vld [vmem:[#allocation2 + $0x118] sm:$0xff]  ;;  %v3334_v55 = vunpack.c.h.bf16 %v2315_v42 }
  0x55   :  { %v3331_v57 = vunpack.c.l.bf16 %v2311_v56  ;;  %v3330_v47 = vunpack.c.h.bf16 %v2311_v56 }
  0x57   :  { %v328_v39 = vmax.f32 %v3331_v57, %v3330_v47  ;;  %v3338_v57 = vunpack.c.l.bf16 %v2337_v16 }
  0x5b   :  { %320 = vmax.xlane.f32.xlu2 %v319_v22  ;;  %317 = vmax.xlane.f32.xlu1 %v316_v63  ;;  %v325_v22 = vmax.f32 %v3333_v41, %v3332_v59  ;;  %v322_v63 = vmax.f32 %v3339_v28, %v3334_v55  ;;  %v3337_v59 = vunpack.c.h.bf16 %v2337_v16  ;;  %v1545_v55 = vld [vmem:[%s3277_s0 + $0x8] sm:$0xff]  }
  0x5c   :  { %314 = vmax.xlane.f32.xlu0 %v313_v58  ;;  %v2335_v58 = vld [vmem:[#allocation2 + $0x128] sm:$0xff]  ;;  %v2389_v5 = vunpack.c.h.bf16 %v1545_v55 }
  0x5d   :  { %3500 = vst [vmem:[#allocation8_spill] sm:$0xff] %v2335_v58  ;;  %v3336_v15 = vunpack.c.l.bf16 %v2335_v58  ;;  %v3335_v47 = vunpack.c.h.bf16 %v2335_v58 }
  0x5e   :  { %3507 = vst [vmem:[#allocation15_spill] sm:$0xff] %v2389_v5 }
  0x5f   :  { %v334_v41 = vmax.f32 %v3336_v15, %v3335_v47  ;;  %v1470_v47 = vld [vmem:[%s3277_s0] sm:$0xff]  }
  0x60   :  { %v2391_v4 = vunpack.c.h.bf16 %v1470_v47 }
  0x63   :  { %329 = vmax.xlane.f32.xlu2 %v328_v39  ;;  %326 = vmax.xlane.f32.xlu1 %v325_v22  ;;  %v331_v39 = vmax.f32 %v3338_v57, %v3337_v59  ;;  %v2027_v22 = vmov 0  }
  0x64   :  { %323 = vmax.xlane.f32.xlu0 %v322_v63  ;;  %1570 = vset.pattern.permute.xlu2 %v2027_v22  ;;  %v1546_v63 = vld [vmem:[%s3277_s0 + $0x10] sm:$0xff]  }
  0x65   :  { %1576 = vset.pattern.permute.xlu0 %v2027_v22  ;;  %1582 = vset.pattern.permute.xlu1 %v2027_v22  ;;  %v2360_v15 = vunpack.c.l.bf16 %v1546_v63 }
  0x67   :  { %3502 = vst [vmem:[#allocation10_spill] sm:$0xff] %v2360_v15 }
  0x6b   :  { %335 = vmax.xlane.f32.xlu1 %v334_v41  ;;  %v2362_v41 = vunpack.c.l.bf16 %v1545_v55  ;;  %v1547_v55 = vld [vmem:[%s3277_s0 + $0x18] sm:$0xff]  }
  0x6c   :  { %332 = vmax.xlane.f32.xlu0 %v331_v39  ;;  %v2364_v39 = vunpack.c.l.bf16 %v1470_v47 }
  0x6d   :  { %3503 = vst [vmem:[#allocation11_spill] sm:$0xff] %v2362_v41 }
  0x7e   :  { %v237_v59 = vpop.xlane.xlu2 %236  ;;  %v231_v22 = vpop.xlane.xlu1 %230 }
  0x7f   :  { %v2367_v57 = vmax.f32 %v2360_v15, %v237_v59  ;;  %v2370_v28 = vmax.f32 %v2362_v41, %v231_v22  ;;  %v225_v44 = vpop.xlane.xlu0 %224 }
  0x80   :  { %v2373_v43 = vmax.f32 %v2364_v39, %v225_v44  ;;  %v2387_v44 = vunpack.c.h.bf16 %v1546_v63  ;;  %v1548_v63 = vld [vmem:[%s3277_s0 + $0x20] sm:$0xff]  }
  0x81   :  { %3504 = vst [vmem:[#allocation12_spill] sm:$0xff] %v2367_v57  ;;  %v2424_v31 = vunpack.c.l.bf16 %v1548_v63 }
  0x82   :  { %3505 = vst [vmem:[#allocation13_spill] sm:$0xff] %v2370_v28 }
  0x83   :  { %3506 = vst [vmem:[#allocation14_spill] sm:$0xff] %v2387_v44 }
  0x84   :  { %3510 = vst [vmem:[#allocation18_spill] sm:$0xff] %v2424_v31 }
  0x86   :  { %v240_v18 = vpop.xlane.xlu2 %239  ;;  %v234_v3 = vpop.xlane.xlu1 %233 }
  0x87   :  { %v2394_v17 = vmax.f32 %v2387_v44, %v240_v18  ;;  %v2397_v6 = vmax.f32 %v2389_v5, %v234_v3  ;;  %v228_v59 = vpop.xlane.xlu0 %227  ;;  %v2426_v18 = vunpack.c.h.bf16 %v1547_v55  ;;  %v2428_v3 = vunpack.c.l.bf16 %v1547_v55 }
  0x88   :  { %v2400_v22 = vmax.f32 %v2391_v4, %v228_v59 }
  0x89   :  { %3508 = vst [vmem:[#allocation16_spill] sm:$0xff] %v2394_v17  ;;  %v1577_v32 = vpack.i.bf16 %v2397_v6, %v2370_v28  ;;  %v1583_v59 = vpack.i.bf16 %v2394_v17, %v2367_v57 }
  0x8a   :  { %3509 = vst [vmem:[#allocation17_spill] sm:$0xff] %v2397_v6  ;;  %v1571_v47 = vpack.i.bf16 %v2400_v22, %v2373_v43 }
  0x8b   :  { %3511 = vst [vmem:[#allocation19_spill] sm:$0xff] %v2426_v18  ;;  %1578 = vperm.xlu0 %1576, %v1577_v32   ;;  %1584 = vperm.xlu1 %1582, %v1583_v59   ;;  %v1549_v32 = vld [vmem:[%s3277_s0 + $0x28] sm:$0xff]  }
  0x8c   :  { %3512 = vst [vmem:[#allocation20_spill] sm:$0xff] %v2428_v3  ;;  %1572 = vperm.xlu2 %1570, %v1571_v47   ;;  %v2458_v44 = vunpack.c.h.bf16 %v1549_v32  ;;  %v2460_v55 = vunpack.c.l.bf16 %v1549_v32  ;;  %v2462_v47 = vunpack.c.h.bf16 %v1548_v63  ;;  %v1551_v32 = vld [vmem:[%s3277_s0 + $0x38] sm:$0xff]  }
  0x8e   :  { %v249_v30 = vpop.xlane.xlu2 %248  ;;  %v246_v20 = vpop.xlane.xlu1 %245  ;;  %3516 = vst [vmem:[#allocation24_spill] sm:$0xff] %v2458_v44 }
  0x8f   :  { %v2433_v29 = vmax.f32 %v2424_v31, %v249_v30  ;;  %v2436_v19 = vmax.f32 %v2426_v18, %v246_v20  ;;  %v243_v8 = vpop.xlane.xlu0 %242  ;;  %3517 = vst [vmem:[#allocation25_spill] sm:$0xff] %v2460_v55 }
  0x90   :  { %v2439_v7 = vmax.f32 %v2428_v3, %v243_v8  ;;  %3518 = vst [vmem:[#allocation26_spill] sm:$0xff] %v2462_v47 }
  0x91   :  { %3513 = vst [vmem:[#allocation21_spill] sm:$0xff] %v2433_v29 }
  0x92   :  { %3514 = vst [vmem:[#allocation22_spill] sm:$0xff] %v2436_v19  ;;  %v1588_v17 = vpack.i.bf16 %v2436_v19, %v2439_v7  ;;  %v2495_v19 = vunpack.c.l.bf16 %v1551_v32 }
  0x93   :  { %3515 = vst [vmem:[#allocation23_spill] sm:$0xff] %v2439_v7 }
  0x94   :  { %1589 = vperm.xlu2 %1570, %v1588_v17   ;;  %v1550_v17 = vld [vmem:[%s3277_s0 + $0x30] sm:$0xff]   ;;  %3522 = vst [vmem:[#allocation30_spill] sm:$0xff] %v2495_v19 }
  0x96   :  { %v258_v30 = vpop.xlane.xlu2 %257  ;;  %v255_v31 = vpop.xlane.xlu1 %254 }
  0x97   :  { %v2465_v20 = vmax.f32 %v2458_v44, %v258_v30  ;;  %v2468_v8 = vmax.f32 %v2460_v55, %v255_v31  ;;  %v252_v16 = vpop.xlane.xlu0 %251  ;;  %v2497_v30 = vunpack.c.h.bf16 %v1550_v17  ;;  %v2499_v31 = vunpack.c.l.bf16 %v1550_v17 }
  0x98   :  { %v2471_v59 = vmax.f32 %v2462_v47, %v252_v16  ;;  %v2531_v17 = vunpack.c.h.bf16 %v1551_v32 }
  0x99   :  { %3519 = vst [vmem:[#allocation27_spill] sm:$0xff] %v2465_v20  ;;  %v1598_v15 = vpack.i.bf16 %v2465_v20, %v2468_v8 }
  0x9a   :  { %3520 = vst [vmem:[#allocation28_spill] sm:$0xff] %v2468_v8  ;;  %v1593_v63 = vpack.i.bf16 %v2471_v59, %v2433_v29  ;;  %v1552_v29 = vld [vmem:[%s3277_s0 + $0x40] sm:$0xff]  }
  0x9b   :  { %3521 = vst [vmem:[#allocation29_spill] sm:$0xff] %v2471_v59  ;;  %1599 = vperm.xlu1 %1582, %v1598_v15   ;;  %v2527_v59 = vunpack.c.h.bf16 %v1552_v29  ;;  %v2529_v15 = vunpack.c.l.bf16 %v1552_v29  ;;  %v1554_v29 = vld [vmem:[%s3277_s0 + $0x50] sm:$0xff]  }
  0x9c   :  { %3523 = vst [vmem:[#allocation31_spill] sm:$0xff] %v2497_v30  ;;  %1594 = vperm.xlu2 %1570, %v1593_v63   ;;  %v2564_v47 = vunpack.c.l.bf16 %v1554_v29 }
  0x9d   :  { %3524 = vst [vmem:[#allocation32_spill] sm:$0xff] %v2499_v31 }
  0x9e   :  { %v267_v16 = vpop.xlane.xlu2 %266  ;;  %v264_v44 = vpop.xlane.xlu1 %263  ;;  %3528 = vst [vmem:[#allocation36_spill] sm:$0xff] %v2527_v59 }
  0x9f   :  { %v2502_v58 = vmax.f32 %v2495_v19, %v267_v16  ;;  %v2505_v57 = vmax.f32 %v2497_v30, %v264_v44  ;;  %v261_v20 = vpop.xlane.xlu0 %260  ;;  %3529 = vst [vmem:[#allocation37_spill] sm:$0xff] %v2529_v15 }
  0xa0   :  { %v2508_v8 = vmax.f32 %v2499_v31, %v261_v20  ;;  %3530 = vst [vmem:[#allocation38_spill] sm:$0xff] %v2531_v17 }
  0xa1   :  { %3525 = vst [vmem:[#allocation33_spill] sm:$0xff] %v2502_v58 }
  0xa2   :  { %3526 = vst [vmem:[#allocation34_spill] sm:$0xff] %v2505_v57  ;;  %v1603_v55 = vpack.i.bf16 %v2505_v57, %v2508_v8 }
  0xa3   :  { %3527 = vst [vmem:[#allocation35_spill] sm:$0xff] %v2508_v8 }
  0xa4   :  { %1604 = vperm.xlu2 %1570, %v1603_v55   ;;  %v1553_v55 = vld [vmem:[%s3277_s0 + $0x48] sm:$0xff]   ;;  %3534 = vst [vmem:[#allocation42_spill] sm:$0xff] %v2564_v47 }
  0xa6   :  { %v276_v63 = vpop.xlane.xlu2 %275  ;;  %v273_v19 = vpop.xlane.xlu1 %272 }
  0xa7   :  { %v2534_v44 = vmax.f32 %v2527_v59, %v276_v63  ;;  %v2537_v20 = vmax.f32 %v2529_v15, %v273_v19  ;;  %v270_v30 = vpop.xlane.xlu0 %269  ;;  %v2566_v63 = vunpack.c.h.bf16 %v1553_v55  ;;  %v2568_v19 = vunpack.c.l.bf16 %v1553_v55 }
  0xa8   :  { %v2540_v16 = vmax.f32 %v2531_v17, %v270_v30  ;;  %v2600_v55 = vunpack.c.h.bf16 %v1554_v29 }
  0xa9   :  { %3531 = vst [vmem:[#allocation39_spill] sm:$0xff] %v2534_v44  ;;  %v1613_v32 = vpack.i.bf16 %v2534_v44, %v2537_v20 }
  0xaa   :  { %3532 = vst [vmem:[#allocation40_spill] sm:$0xff] %v2537_v20  ;;  %v1608_v57 = vpack.i.bf16 %v2540_v16, %v2502_v58  ;;  %v1555_v20 = vld [vmem:[%s3277_s0 + $0x58] sm:$0xff]  }
  0xab   :  { %3533 = vst [vmem:[#allocation41_spill] sm:$0xff] %v2540_v16  ;;  %1614 = vperm.xlu0 %1576, %v1613_v32   ;;  %v2596_v16 = vunpack.c.h.bf16 %v1555_v20 }
  0xac   :  { %3535 = vst [vmem:[#allocation43_spill] sm:$0xff] %v2566_v63  ;;  %1609 = vperm.xlu1 %1582, %v1608_v57   ;;  %v2598_v57 = vunpack.c.l.bf16 %v1555_v20  ;;  %v1557_v20 = vld [vmem:[%s3277_s0 + $0x68] sm:$0xff]  }
  0xad   :  { %3536 = vst [vmem:[#allocation44_spill] sm:$0xff] %v2568_v19  ;;  %v2633_v17 = vunpack.c.l.bf16 %v1557_v20 }
  0xae   :  { %v285_v30 = vpop.xlane.xlu2 %284  ;;  %v282_v15 = vpop.xlane.xlu1 %281  ;;  %3540 = vst [vmem:[#allocation48_spill] sm:$0xff] %v2596_v16 }
  0xaf   :  { %v2571_v8 = vmax.f32 %v2564_v47, %v285_v30  ;;  %v2574_v31 = vmax.f32 %v2566_v63, %v282_v15  ;;  %v279_v59 = vpop.xlane.xlu0 %278  ;;  %3541 = vst [vmem:[#allocation49_spill] sm:$0xff] %v2598_v57 }
  0xb0   :  { %v2577_v58 = vmax.f32 %v2568_v19, %v279_v59  ;;  %3542 = vst [vmem:[#allocation50_spill] sm:$0xff] %v2600_v55 }
  0xb1   :  { %3537 = vst [vmem:[#allocation45_spill] sm:$0xff] %v2571_v8 }
  0xb2   :  { %3538 = vst [vmem:[#allocation46_spill] sm:$0xff] %v2574_v31  ;;  %v1618_v44 = vpack.i.bf16 %v2574_v31, %v2577_v58 }
  0xb3   :  { %3539 = vst [vmem:[#allocation47_spill] sm:$0xff] %v2577_v58 }
  0xb4   :  { %1619 = vperm.xlu2 %1570, %v1618_v44   ;;  %v1556_v44 = vld [vmem:[%s3277_s0 + $0x60] sm:$0xff]   ;;  %3546 = vst [vmem:[#allocation54_spill] sm:$0xff] %v2633_v17 }
  0xb6   :  { %v294_v32 = vpop.xlane.xlu2 %293  ;;  %v291_v47 = vpop.xlane.xlu1 %290 }
  0xb7   :  { %v2603_v15 = vmax.f32 %v2596_v16, %v294_v32  ;;  %v2606_v59 = vmax.f32 %v2598_v57, %v291_v47  ;;  %v288_v63 = vpop.xlane.xlu0 %287  ;;  %v2635_v32 = vunpack.c.h.bf16 %v1556_v44  ;;  %v2637_v47 = vunpack.c.l.bf16 %v1556_v44 }
  0xb8   :  { %v2609_v30 = vmax.f32 %v2600_v55, %v288_v63  ;;  %v2669_v44 = vunpack.c.h.bf16 %v1557_v20 }
  0xb9   :  { %3543 = vst [vmem:[#allocation51_spill] sm:$0xff] %v2603_v15  ;;  %v1628_v29 = vpack.i.bf16 %v2603_v15, %v2606_v59 }
  0xba   :  { %3544 = vst [vmem:[#allocation52_spill] sm:$0xff] %v2606_v59  ;;  %v1623_v31 = vpack.i.bf16 %v2609_v30, %v2571_v8  ;;  %v1558_v59 = vld [vmem:[%s3277_s0 + $0x70] sm:$0xff]  }
  0xbb   :  { %3545 = vst [vmem:[#allocation53_spill] sm:$0xff] %v2609_v30  ;;  %1629 = vperm.xlu0 %1576, %v1628_v29   ;;  %v2665_v15 = vunpack.c.h.bf16 %v1558_v59 }
  0xbc   :  { %3547 = vst [vmem:[#allocation55_spill] sm:$0xff] %v2635_v32  ;;  %1624 = vperm.xlu1 %1582, %v1623_v31   ;;  %v2667_v31 = vunpack.c.l.bf16 %v1558_v59  ;;  %v1560_v59 = vld [vmem:[%s3277_s0 + $0x80] sm:$0xff]  }
  0xbd   :  { %3548 = vst [vmem:[#allocation56_spill] sm:$0xff] %v2637_v47  ;;  %v2702_v16 = vunpack.c.l.bf16 %v1560_v59 }
  0xbe   :  { %v303_v63 = vpop.xlane.xlu2 %302  ;;  %v300_v57 = vpop.xlane.xlu1 %299  ;;  %3552 = vst [vmem:[#allocation60_spill] sm:$0xff] %v2665_v15 }
  0xbf   :  { %v2640_v58 = vmax.f32 %v2633_v17, %v303_v63  ;;  %v2643_v19 = vmax.f32 %v2635_v32, %v300_v57  ;;  %v297_v8 = vpop.xlane.xlu0 %296  ;;  %3553 = vst [vmem:[#allocation61_spill] sm:$0xff] %v2667_v31 }
  0xc0   :  { %v2646_v30 = vmax.f32 %v2637_v47, %v297_v8  ;;  %3554 = vst [vmem:[#allocation62_spill] sm:$0xff] %v2669_v44 }
  0xc1   :  { %3549 = vst [vmem:[#allocation57_spill] sm:$0xff] %v2640_v58 }
  0xc2   :  { %3550 = vst [vmem:[#allocation58_spill] sm:$0xff] %v2643_v19  ;;  %v1633_v55 = vpack.i.bf16 %v2643_v19, %v2646_v30 }
  0xc3   :  { %3551 = vst [vmem:[#allocation59_spill] sm:$0xff] %v2646_v30 }
  0xc4   :  { %1634 = vperm.xlu2 %1570, %v1633_v55   ;;  %v1559_v55 = vld [vmem:[%s3277_s0 + $0x78] sm:$0xff]   ;;  %3558 = vst [vmem:[#allocation66_spill] sm:$0xff] %v2702_v16 }
  0xc6   :  { %v312_v29 = vpop.xlane.xlu2 %311  ;;  %v309_v17 = vpop.xlane.xlu1 %308 }
  0xc7   :  { %v2672_v57 = vmax.f32 %v2665_v15, %v312_v29  ;;  %v2675_v8 = vmax.f32 %v2667_v31, %v309_v17  ;;  %v306_v32 = vpop.xlane.xlu0 %305  ;;  %v2704_v29 = vunpack.c.h.bf16 %v1559_v55  ;;  %v2706_v17 = vunpack.c.l.bf16 %v1559_v55 }
  0xc8   :  { %v2678_v63 = vmax.f32 %v2669_v44, %v306_v32  ;;  %v2738_v55 = vunpack.c.h.bf16 %v1560_v59 }
  0xc9   :  { %3555 = vst [vmem:[#allocation63_spill] sm:$0xff] %v2672_v57  ;;  %v1643_v20 = vpack.i.bf16 %v2672_v57, %v2675_v8 }
  0xca   :  { %3556 = vst [vmem:[#allocation64_spill] sm:$0xff] %v2675_v8  ;;  %v1638_v47 = vpack.i.bf16 %v2678_v63, %v2640_v58  ;;  %v1561_v8 = vld [vmem:[%s3277_s0 + $0x88] sm:$0xff]  }
  0xcb   :  { %3557 = vst [vmem:[#allocation65_spill] sm:$0xff] %v2678_v63  ;;  %1644 = vperm.xlu0 %1576, %v1643_v20   ;;  %v2734_v15 = vunpack.c.h.bf16 %v1561_v8 }
  0xcc   :  { %3559 = vst [vmem:[#allocation67_spill] sm:$0xff] %v2704_v29  ;;  %1639 = vperm.xlu1 %1582, %v1638_v47   ;;  %v2736_v47 = vunpack.c.l.bf16 %v1561_v8 }
  0xcd   :  { %3560 = vst [vmem:[#allocation68_spill] sm:$0xff] %v2706_v17 }
  0xce   :  { %v321_v32 = vpop.xlane.xlu2 %320  ;;  %v318_v31 = vpop.xlane.xlu1 %317  ;;  %3564 = vst [vmem:[#allocation72_spill] sm:$0xff] %v2734_v15 }
  0xcf   :  { %v2709_v19 = vmax.f32 %v2702_v16, %v321_v32  ;;  %v2712_v30 = vmax.f32 %v2704_v29, %v318_v31  ;;  %v315_v63 = vpop.xlane.xlu0 %314  ;;  %3565 = vst [vmem:[#allocation73_spill] sm:$0xff] %v2736_v47 }
  0xd0   :  { %v2715_v44 = vmax.f32 %v2706_v17, %v315_v63  ;;  %3566 = vst [vmem:[#allocation74_spill] sm:$0xff] %v2738_v55 }
  0xd1   :  { %3561 = vst [vmem:[#allocation69_spill] sm:$0xff] %v2709_v19 }
  0xd2   :  { %3562 = vst [vmem:[#allocation70_spill] sm:$0xff] %v2712_v30  ;;  %v1648_v57 = vpack.i.bf16 %v2712_v30, %v2715_v44 }
  0xd3   :  { %3563 = vst [vmem:[#allocation71_spill] sm:$0xff] %v2715_v44 }
  0xd4   :  { %1649 = vperm.xlu2 %1570, %v1648_v57   ;;  %v1562_v57 = vld [vmem:[%s3277_s0 + $0x90] sm:$0xff]  }
  0xd5   :  { %v2768_v8 = vunpack.c.l.bf16 %v1562_v57 }
  0xd6   :  { %v330_v20 = vpop.xlane.xlu2 %329  ;;  %v327_v16 = vpop.xlane.xlu1 %326 }
  0xd7   :  { %v2741_v31 = vmax.f32 %v2734_v15, %v330_v20  ;;  %v2744_v63 = vmax.f32 %v2736_v47, %v327_v16  ;;  %v324_v29 = vpop.xlane.xlu0 %323  ;;  %3570 = vst [vmem:[#allocation78_spill] sm:$0xff] %v2768_v8  ;;  %v3572_v20 = vunpack.c.l.bf16 %v2051_v2  ;;  %v3573_v47 = vunpack.c.h.bf16 %v2051_v2 }
  0xd8   :  { %v2747_v32 = vmax.f32 %v2738_v55, %v324_v29  ;;  %v3577_v2 = vunpack.c.h.bf16 %v2099_v26 }
  0xd9   :  { %3567 = vst [vmem:[#allocation75_spill] sm:$0xff] %v2741_v31  ;;  %v1658_v30 = vpack.i.bf16 %v2741_v31, %v2744_v63 }
  0xda   :  { %3568 = vst [vmem:[#allocation76_spill] sm:$0xff] %v2744_v63  ;;  %v1653_v29 = vpack.i.bf16 %v2747_v32, %v2709_v19 }
  0xdb   :  { %3569 = vst [vmem:[#allocation77_spill] sm:$0xff] %v2747_v32  ;;  %1659 = vperm.xlu0 %1576, %v1658_v30   ;;  %v2777_v32 = vunpack.c.h.bf16 %v1562_v57 }
  0xdc   :  { %1654 = vperm.xlu1 %1582, %v1653_v29   ;;  %v3575_v29 = vunpack.c.h.bf16 %v2071_v13 }
  0xdd   :  { %3571 = vst [vmem:[#allocation79_spill] sm:$0xff] %v2777_v32 }
  0xde   :  { %v336_v63 = vpop.xlane.xlu1 %335 }
  0xdf   :  { %v333_v59 = vpop.xlane.xlu0 %332  ;;  %v2780_v55 = vmax.f32 %v2777_v32, %v336_v63  ;;  %v3574_v63 = vunpack.c.l.bf16 %v2071_v13 }
  0xe0   :  { %v2771_v16 = vmax.f32 %v2768_v8, %v333_v59 }
  0xe6   :  { %v1573_v59 = vpop.permute.xlu2 %1572 }
  0xe7   :  { %v1574_v31 = vunpack.i.l.bf16 %v1573_v59  ;;  %v1575_v15 = vunpack.i.h.bf16 %v1573_v59  ;;  %v3576_v59 = vunpack.c.l.bf16 %v2099_v26 }
  0xe9   :  { %v717_v44 = vsub.f32 %v3572_v20, %v1574_v31  ;;  %v718_v57 = vsub.f32 %v3573_v47, %v1574_v31  ;;  %v719_v19 = vsub.f32 %v3574_v63, %v1575_v15  ;;  %v720_v18 = vsub.f32 %v3575_v29, %v1575_v15 }
  0xeb   :  { %v793_v8 = vmul.f32 10.0, %v717_v44  ;;  %v794_v17 = vmul.f32 10.0, %v718_v57  ;;  %v795_v41 = vmul.f32 10.0, %v719_v19  ;;  %v796_v6 = vmul.f32 10.0, %v720_v18 }
  0xed   :  { %v869_v58 = vmul.f32 1.442695, %v793_v8  ;;  %v871_v28 = vmul.f32 1.442695, %v794_v17  ;;  %v873_v47 = vmul.f32 1.442695, %v795_v41  ;;  %v3578_v41 = vunpack.c.l.bf16 %v2097_v25 }
  0xee   :  { %v1590_v30 = vpop.permute.xlu2 %1589  ;;  %v875_v57 = vmul.f32 1.442695, %v796_v6 }
  0xef   :  { %v1591_v32 = vunpack.i.l.bf16 %v1590_v30  ;;  %1668 = vpow2.f32 %v869_v58  ;;  %v1592_v58 = vunpack.i.h.bf16 %v1590_v30 }
  0xf0   :  { %1670 = vpow2.f32 %v871_v28 }
  0xf1   :  { %v729_v20 = vsub.f32 %v3576_v59, %v1591_v32  ;;  %v730_v44 = vsub.f32 %v3577_v2, %v1591_v32  ;;  %1672 = vpow2.f32 %v873_v47  ;;  %v731_v6 = vsub.f32 %v3578_v41, %v1592_v58 }
  0xf2   :  { %1674 = vpow2.f32 %v875_v57  ;;  %v3579_v59 = vunpack.c.l.bf16 %v2061_v10  ;;  %v3580_v2 = vunpack.c.h.bf16 %v2061_v10  ;;  %v3581_v47 = vunpack.c.l.bf16 %v2049_v1 }
  0xf3   :  { %v805_v31 = vmul.f32 10.0, %v729_v20  ;;  %v806_v8 = vmul.f32 10.0, %v730_v44  ;;  %v807_v10 = vmul.f32 10.0, %v731_v6  ;;  %v3586_v6 = vunpack.c.l.bf16 %v2123_v38 }
  0xf5   :  { %v1669_v63 = vpop.eup %1668  ;;  %v893_v15 = vmul.f32 1.442695, %v805_v31  ;;  %v895_v17 = vmul.f32 1.442695, %v806_v8  ;;  %v3582_v31 = vunpack.c.h.bf16 %v2097_v25  ;;  %v3583_v8 = vunpack.c.h.bf16 %v2049_v1 }
  0xf6   :  { %v1671_v13 = vpop.eup %1670 }
  0xf7   :  { %v1021_v19 = vadd.f32 %v1671_v13, %v1669_v63  ;;  %1676 = vpow2.f32 %v893_v15  ;;  %v1673_v26 = vpop.eup %1672  ;;  %v732_v57 = vsub.f32 %v3582_v31, %v1592_v58 }
  0xf8   :  { %1678 = vpow2.f32 %v895_v17  ;;  %v1675_v32 = vpop.eup %1674 }
  0xf9   :  { %v808_v3 = vmul.f32 10.0, %v732_v57 }
  0xfb   :  { %v899_v31 = vmul.f32 1.442695, %v808_v3 }
  0xfd   :  { %1022 = vadd.xlane.f32.xlu2 %v1021_v19  ;;  %v1579_v29 = vpop.permute.xlu0 %1578  ;;  %v1677_v19 = vpop.eup %1676 }
  0xfe   :  { %v1581_v28 = vunpack.i.h.bf16 %v1579_v29  ;;  %v1580_v18 = vunpack.i.l.bf16 %v1579_v29  ;;  %v1595_v29 = vpop.permute.xlu2 %1594  ;;  %v1585_v5 = vpop.permute.xlu1 %1584 }
  0xff   :  { %v1679_v7 = vpop.eup %1678  ;;  %v1586_v58 = vunpack.i.l.bf16 %v1585_v5 }
 0x100   :  { %v723_v20 = vsub.f32 %v3579_v59, %v1581_v28  ;;  %v724_v44 = vsub.f32 %v3580_v2, %v1581_v28  ;;  %v721_v30 = vsub.f32 %v3581_v47, %v1580_v18  ;;  %v722_v63 = vsub.f32 %v3583_v8, %v1580_v18 }
 0x101   :  { %v1024_v59 = vadd.f32 %v1675_v32, %v1673_v26  ;;  %v1597_v47 = vunpack.i.h.bf16 %v1595_v29  ;;  %v1039_v18 = vadd.f32 %v1679_v7, %v1677_v19  ;;  %v3585_v26 = vunpack.c.h.bf16 %v2047_v0 }
 0x102   :  { %v799_v13 = vmul.f32 10.0, %v723_v20  ;;  %v800_v15 = vmul.f32 10.0, %v724_v44  ;;  %v797_v17 = vmul.f32 10.0, %v721_v30  ;;  %v798_v41 = vmul.f32 10.0, %v722_v63 }
 0x103   :  { %v897_v20 = vmul.f32 1.442695, %v807_v10  ;;  %v3584_v44 = vunpack.c.l.bf16 %v2047_v0  ;;  %v726_v32 = vsub.f32 %v3585_v26, %v1586_v58  ;;  %v735_v57 = vsub.f32 %v3586_v6, %v1597_v47 }
 0x104   :  { %v881_v28 = vmul.f32 1.442695, %v799_v13  ;;  %v883_v2 = vmul.f32 1.442695, %v800_v15  ;;  %v877_v25 = vmul.f32 1.442695, %v797_v17  ;;  %v1587_v8 = vunpack.i.h.bf16 %v1585_v5 }
 0x105   :  { %v879_v1 = vmul.f32 1.442695, %v798_v41  ;;  %v725_v30 = vsub.f32 %v3584_v44, %v1586_v58  ;;  %1040 = vadd.xlane.f32.xlu2 %v1039_v18  ;;  %v3587_v13 = vunpack.c.h.bf16 %v2123_v38  ;;  %v802_v7 = vmul.f32 10.0, %v726_v32 }
 0x106   :  { %1025 = vadd.xlane.f32.xlu1 %v1024_v59  ;;  %1680 = vpow2.f32 %v881_v28  ;;  %v811_v41 = vmul.f32 10.0, %v735_v57  ;;  %v3588_v0 = vunpack.c.l.bf16 %v2059_v9  ;;  %v3589_v5 = vunpack.c.h.bf16 %v2059_v9  ;;  %v2824_v57 = vpop.permute.xlu2 %1604 }
 0x107   :  { %1682 = vpow2.f32 %v883_v2  ;;  %v801_v63 = vmul.f32 10.0, %v725_v30  ;;  %v736_v15 = vsub.f32 %v3587_v13, %v1597_v47  ;;  %v887_v58 = vmul.f32 1.442695, %v802_v7 }
 0x108   :  { %1684 = vpow2.f32 %v877_v25  ;;  %v727_v59 = vsub.f32 %v3588_v0, %v1587_v8  ;;  %v728_v25 = vsub.f32 %v3589_v5, %v1587_v8  ;;  %v1596_v18 = vunpack.i.l.bf16 %v1595_v29 }
 0x109   :  { %1686 = vpow2.f32 %v879_v1  ;;  %v885_v10 = vmul.f32 1.442695, %v801_v63  ;;  %v812_v2 = vmul.f32 10.0, %v736_v15  ;;  %v905_v44 = vmul.f32 1.442695, %v811_v41 }
 0x10a   :  { %1688 = vpow2.f32 %v897_v20  ;;  %v803_v30 = vmul.f32 10.0, %v727_v59  ;;  %v804_v63 = vmul.f32 10.0, %v728_v25  ;;  %v3591_v9 = vunpack.c.h.bf16 %v2121_v37 }
 0x10b   :  { %1690 = vpow2.f32 %v899_v31  ;;  %v3590_v31 = vunpack.c.l.bf16 %v2121_v37  ;;  %v907_v6 = vmul.f32 1.442695, %v812_v2  ;;  %v3592_v29 = vunpack.c.l.bf16 %v2095_v24 }
 0x10c   :  { %v1681_v17 = vpop.eup %1680  ;;  %1692 = vpow2.f32 %v885_v10  ;;  %v3593_v7 = vunpack.c.h.bf16 %v2095_v24  ;;  %v889_v41 = vmul.f32 1.442695, %v803_v30  ;;  %v891_v59 = vmul.f32 1.442695, %v804_v63 }
 0x10d   :  { %v1683_v19 = vpop.eup %1682  ;;  %v1600_v3 = vpop.permute.xlu1 %1599  ;;  %1694 = vpow2.f32 %v887_v58  ;;  %v733_v15 = vsub.f32 %v3592_v29, %v1596_v18  ;;  %v3594_v25 = vunpack.c.l.bf16 %v2145_v49 }
 0x10e   :  { %v1601_v28 = vunpack.i.l.bf16 %v1600_v3  ;;  %v1030_v38 = vadd.f32 %v1683_v19, %v1681_v17  ;;  %v1685_v47 = vpop.eup %1684  ;;  %v734_v17 = vsub.f32 %v3593_v7, %v1596_v18  ;;  %1696 = vpow2.f32 %v905_v44 }
 0x10f   :  { %v1687_v1 = vpop.eup %1686  ;;  %v1607_v19 = vunpack.i.h.bf16 %v2824_v57  ;;  %1698 = vpow2.f32 %v907_v6  ;;  %v1602_v24 = vunpack.i.h.bf16 %v1600_v3 }
 0x110   :  { %1031 = vadd.xlane.f32.xlu1 %v1030_v38  ;;  %v1689_v20 = vpop.eup %1688  ;;  %v737_v26 = vsub.f32 %v3590_v31, %v1601_v28  ;;  %v738_v8 = vsub.f32 %v3591_v9, %v1601_v28  ;;  %v1027_v13 = vadd.f32 %v1687_v1, %v1685_v47  ;;  %v809_v28 = vmul.f32 10.0, %v733_v15 }
 0x111   :  { %v1691_v32 = vpop.eup %1690  ;;  %v743_v58 = vsub.f32 %v3594_v25, %v1607_v19  ;;  %1700 = vpow2.f32 %v889_v41  ;;  %v810_v47 = vmul.f32 10.0, %v734_v17  ;;  %v3595_v1 = vunpack.c.h.bf16 %v2145_v49 }
 0x112   :  { %v813_v0 = vmul.f32 10.0, %v737_v26  ;;  %1028 = vadd.xlane.f32.xlu0 %v1027_v13  ;;  %v814_v10 = vmul.f32 10.0, %v738_v8  ;;  %v1042_v2 = vadd.f32 %v1691_v32, %v1689_v20  ;;  %v1693_v5 = vpop.eup %1692  ;;  %1702 = vpow2.f32 %v891_v59 }
 0x113   :  { %v1695_v37 = vpop.eup %1694  ;;  %v744_v18 = vsub.f32 %v3595_v1, %v1607_v19  ;;  %v1663_v20 = vpack.i.bf16 %v2780_v55, %v2771_v16  ;;  %v901_v6 = vmul.f32 1.442695, %v809_v28  ;;  %v819_v63 = vmul.f32 10.0, %v743_v58 }
 0x114   :  { %v909_v38 = vmul.f32 1.442695, %v813_v0  ;;  %v911_v44 = vmul.f32 1.442695, %v814_v10  ;;  %v1697_v30 = vpop.eup %1696  ;;  %v1033_v31 = vadd.f32 %v1695_v37, %v1693_v5  ;;  %v3596_v9 = vunpack.c.l.bf16 %v2119_v36 }
 0x115   :  { %v1699_v26 = vpop.eup %1698  ;;  %v903_v3 = vmul.f32 1.442695, %v810_v47  ;;  %v820_v13 = vmul.f32 10.0, %v744_v18  ;;  %v3597_v49 = vunpack.c.h.bf16 %v2119_v36  ;;  %v921_v41 = vmul.f32 1.442695, %v819_v63 }
 0x116   :  { %v739_v8 = vsub.f32 %v3596_v9, %v1602_v24  ;;  %1704 = vpow2.f32 %v909_v38  ;;  %v1048_v17 = vadd.f32 %v1699_v26, %v1697_v30  ;;  %v3598_v37 = vunpack.c.l.bf16 %v2171_v62 }
 0x117   :  { %v740_v29 = vsub.f32 %v3597_v49, %v1602_v24  ;;  %1706 = vpow2.f32 %v911_v44  ;;  %v1701_v15 = vpop.eup %1700  ;;  %v923_v10 = vmul.f32 1.442695, %v820_v13  ;;  %v3599_v58 = vunpack.c.h.bf16 %v2171_v62 }
 0x118   :  { %1043 = vadd.xlane.f32.xlu1 %v1042_v2  ;;  %v1703_v19 = vpop.eup %1702  ;;  %1708 = vpow2.f32 %v901_v6  ;;  %v815_v0 = vmul.f32 10.0, %v739_v8  ;;  %v3600_v1 = vunpack.c.l.bf16 %v2143_v48  ;;  %v3601_v30 = vunpack.c.h.bf16 %v2143_v48 }
 0x119   :  { %1710 = vpow2.f32 %v903_v3  ;;  %v816_v2 = vmul.f32 10.0, %v740_v29  ;;  %v1036_v36 = vadd.f32 %v1703_v19, %v1701_v15  ;;  %v1606_v49 = vunpack.i.l.bf16 %v2824_v57  ;;  %v1620_v29 = vpop.permute.xlu2 %1619 }
 0x11a   :  { %1034 = vadd.xlane.f32.xlu0 %v1033_v31  ;;  %1712 = vpow2.f32 %v921_v41  ;;  %v913_v47 = vmul.f32 1.442695, %v815_v0  ;;  %v3602_v48 = vunpack.c.l.bf16 %v2167_v60  ;;  %v3603_v0 = vunpack.c.h.bf16 %v2167_v60 }
 0x11b   :  { %1714 = vpow2.f32 %v923_v10  ;;  %v915_v44 = vmul.f32 1.442695, %v816_v2  ;;  %v3604_v2 = vunpack.c.l.bf16 %v2169_v61  ;;  %v3605_v57 = vunpack.c.h.bf16 %v2169_v61 }
 0x11c   :  { %v1705_v5 = vpop.eup %1704  ;;  %1716 = vpow2.f32 %v913_v47  ;;  %v3607_v60 = vunpack.c.h.bf16 %v2147_v50  ;;  %v3608_v61 = vunpack.c.l.bf16 %v2193_v45 }
 0x11d   :  { %1664 = vperm.xlu2 %1570, %v1663_v20   ;;  %v1707_v25 = vpop.eup %1706  ;;  %v1615_v38 = vpop.permute.xlu0 %1614  ;;  %1718 = vpow2.f32 %v915_v44  ;;  %v1621_v44 = vunpack.i.l.bf16 %v1620_v29 }
 0x11e   :  { %v1610_v32 = vpop.permute.xlu1 %1609  ;;  %v1709_v26 = vpop.eup %1708  ;;  %v1051_v6 = vadd.f32 %v1707_v25, %v1705_v5  ;;  %v1616_v8 = vunpack.i.l.bf16 %v1615_v38 }
 0x11f   :  { %v1612_v7 = vunpack.i.h.bf16 %v1610_v32  ;;  %v1611_v59 = vunpack.i.l.bf16 %v1610_v32  ;;  %v1617_v32 = vunpack.i.h.bf16 %v1615_v38  ;;  %v1711_v63 = vpop.eup %1710 }
 0x120   :  { %1049 = vadd.xlane.f32.xlu1 %v1048_v17  ;;  %v1713_v13 = vpop.eup %1712  ;;  %v1045_v17 = vadd.f32 %v1711_v63, %v1709_v26  ;;  %v749_v5 = vsub.f32 %v3604_v2, %v1616_v8 }
 0x121   :  { %v747_v28 = vsub.f32 %v3598_v37, %v1612_v7  ;;  %v748_v24 = vsub.f32 %v3599_v58, %v1612_v7  ;;  %v745_v18 = vsub.f32 %v3600_v1, %v1611_v59  ;;  %v746_v31 = vsub.f32 %v3601_v30, %v1611_v59  ;;  %v1715_v19 = vpop.eup %1714 }
 0x122   :  { %1037 = vadd.xlane.f32.xlu0 %v1036_v36  ;;  %v751_v7 = vsub.f32 %v3602_v48, %v1617_v32  ;;  %v752_v59 = vsub.f32 %v3603_v0, %v1617_v32  ;;  %v1622_v37 = vunpack.i.h.bf16 %v1620_v29  ;;  %v750_v36 = vsub.f32 %v3605_v57, %v1616_v8  ;;  %v1717_v25 = vpop.eup %1716 }
 0x123   :  { %v823_v20 = vmul.f32 10.0, %v747_v28  ;;  %v824_v9 = vmul.f32 10.0, %v748_v24  ;;  %v821_v62 = vmul.f32 10.0, %v745_v18  ;;  %v822_v3 = vmul.f32 10.0, %v746_v31  ;;  %v1719_v1 = vpop.eup %1718 }
 0x124   :  { %v3606_v58 = vunpack.c.l.bf16 %v2147_v50  ;;  %v827_v38 = vmul.f32 10.0, %v751_v7  ;;  %v1060_v47 = vadd.f32 %v1715_v19, %v1713_v13  ;;  %v742_v18 = vsub.f32 %v3607_v60, %v1606_v49 }
 0x125   :  { %v929_v15 = vmul.f32 1.442695, %v823_v20  ;;  %v931_v41 = vmul.f32 1.442695, %v824_v9  ;;  %v925_v10 = vmul.f32 1.442695, %v821_v62  ;;  %v755_v26 = vsub.f32 %v3608_v61, %v1622_v37 }
 0x126   :  { %v927_v28 = vmul.f32 1.442695, %v822_v3  ;;  %v741_v24 = vsub.f32 %v3606_v58, %v1606_v49  ;;  %v828_v30 = vmul.f32 10.0, %v752_v59  ;;  %v825_v31 = vmul.f32 10.0, %v749_v5 }
 0x127   :  { %1720 = vpow2.f32 %v929_v15  ;;  %v826_v20 = vmul.f32 10.0, %v750_v36  ;;  %v937_v9 = vmul.f32 1.442695, %v827_v38  ;;  %v1054_v62 = vadd.f32 %v1719_v1, %v1717_v25  ;;  %v2875_v36 = vpop.permute.xlu2 %1634 }
 0x128   :  { %1052 = vadd.xlane.f32.xlu1 %v1051_v6  ;;  %1722 = vpow2.f32 %v931_v41  ;;  %v3609_v6 = vunpack.c.h.bf16 %v2193_v45  ;;  %v817_v50 = vmul.f32 10.0, %v741_v24  ;;  %v818_v8 = vmul.f32 10.0, %v742_v18 }
 0x129   :  { %1724 = vpow2.f32 %v925_v10  ;;  %v3610_v3 = vunpack.c.l.bf16 %v2195_v46  ;;  %v939_v49 = vmul.f32 1.442695, %v828_v30  ;;  %v933_v48 = vmul.f32 1.442695, %v825_v31 }
 0x12a   :  { %1046 = vadd.xlane.f32.xlu0 %v1045_v17  ;;  %1726 = vpow2.f32 %v927_v28  ;;  %v756_v63 = vsub.f32 %v3609_v6, %v1622_v37  ;;  %v831_v19 = vmul.f32 10.0, %v755_v26  ;;  %v3611_v41 = vunpack.c.h.bf16 %v2195_v46 }
 0x12b   :  { %v753_v13 = vsub.f32 %v3610_v3, %v1621_v44  ;;  %v935_v0 = vmul.f32 1.442695, %v826_v20  ;;  %1728 = vpow2.f32 %v937_v9  ;;  %v917_v37 = vmul.f32 1.442695, %v817_v50 }
 0x12c   :  { %v754_v45 = vsub.f32 %v3611_v41, %v1621_v44  ;;  %v832_v10 = vmul.f32 10.0, %v756_v63  ;;  %v919_v28 = vmul.f32 1.442695, %v818_v8  ;;  %1730 = vpow2.f32 %v939_v49 }
 0x12d   :  { %v2866_v32 = vpop.permute.xlu0 %1629  ;;  %v1721_v15 = vpop.eup %1720  ;;  %v829_v57 = vmul.f32 10.0, %v753_v13  ;;  %1732 = vpow2.f32 %v933_v48  ;;  %v3612_v58 = vunpack.c.l.bf16 %v2215_v34  ;;  %v945_v46 = vmul.f32 1.442695, %v831_v19 }
 0x12e   :  { %v1625_v29 = vpop.permute.xlu1 %1624  ;;  %v1632_v7 = vunpack.i.h.bf16 %v2866_v32  ;;  %v1723_v17 = vpop.eup %1722  ;;  %1734 = vpow2.f32 %v935_v0  ;;  %v3613_v1 = vunpack.c.h.bf16 %v2215_v34  ;;  %v947_v18 = vmul.f32 1.442695, %v832_v10 }
 0x12f   :  { %v1725_v59 = vpop.eup %1724  ;;  %v1627_v2 = vunpack.i.h.bf16 %v1625_v29  ;;  %v1626_v25 = vunpack.i.l.bf16 %v1625_v29  ;;  %v1066_v38 = vadd.f32 %v1723_v17, %v1721_v15  ;;  %v3614_v44 = vunpack.c.l.bf16 %v2219_v11 }
 0x130   :  { %1061 = vadd.xlane.f32.xlu1 %v1060_v47  ;;  %v1727_v5 = vpop.eup %1726  ;;  %v763_v24 = vsub.f32 %v3612_v58, %v1632_v7  ;;  %v830_v47 = vmul.f32 10.0, %v754_v45  ;;  %v764_v60 = vsub.f32 %v3613_v1, %v1632_v7  ;;  %1736 = vpow2.f32 %v917_v37 }
 0x131   :  { %v759_v30 = vsub.f32 %v3614_v44, %v1627_v2  ;;  %v1063_v31 = vadd.f32 %v1727_v5, %v1725_v59  ;;  %v941_v61 = vmul.f32 1.442695, %v829_v57  ;;  %v1636_v26 = vunpack.i.l.bf16 %v2875_v36  ;;  %v1729_v9 = vpop.eup %1728 }
 0x132   :  { %1055 = vadd.xlane.f32.xlu0 %v1054_v62  ;;  %v3615_v20 = vunpack.c.h.bf16 %v2219_v11  ;;  %1738 = vpow2.f32 %v919_v28  ;;  %v3616_v34 = vunpack.c.l.bf16 %v2191_v35  ;;  %v839_v50 = vmul.f32 10.0, %v763_v24  ;;  %v1731_v3 = vpop.eup %1730 }
 0x133   :  { %1740 = vpow2.f32 %v945_v46  ;;  %v943_v13 = vmul.f32 1.442695, %v830_v47  ;;  %v3617_v49 = vunpack.c.h.bf16 %v2191_v35  ;;  %v840_v15 = vmul.f32 10.0, %v764_v60  ;;  %v1733_v11 = vpop.eup %1732 }
 0x134   :  { %v760_v6 = vsub.f32 %v3615_v20, %v1627_v2  ;;  %v757_v62 = vsub.f32 %v3616_v34, %v1626_v25  ;;  %1742 = vpow2.f32 %v947_v18  ;;  %v835_v48 = vmul.f32 10.0, %v759_v30  ;;  %v1735_v7 = vpop.eup %1734 }
 0x135   :  { %v758_v29 = vsub.f32 %v3617_v49, %v1626_v25  ;;  %1744 = vpow2.f32 %v941_v61  ;;  %v3618_v17 = vunpack.c.l.bf16 %v2243_v51  ;;  %v1631_v45 = vunpack.i.l.bf16 %v2866_v32 }
 0x136   :  { %v836_v41 = vmul.f32 10.0, %v760_v6  ;;  %v833_v0 = vmul.f32 10.0, %v757_v62  ;;  %v961_v59 = vmul.f32 1.442695, %v839_v50  ;;  %v3619_v10 = vunpack.c.l.bf16 %v2239_v33  ;;  %v1737_v35 = vpop.eup %1736 }
 0x137   :  { %v765_v19 = vsub.f32 %v3618_v17, %v1636_v26  ;;  %v1072_v5 = vadd.f32 %v1731_v3, %v1729_v9  ;;  %1746 = vpow2.f32 %v943_v13  ;;  %v834_v37 = vmul.f32 10.0, %v758_v29 }
 0x138   :  { %1067 = vadd.xlane.f32.xlu1 %v1066_v38  ;;  %v963_v28 = vmul.f32 1.442695, %v840_v15  ;;  %v3620_v57 = vunpack.c.h.bf16 %v2239_v33  ;;  %v1739_v24 = vpop.eup %1738  ;;  %v3621_v38 = vunpack.c.h.bf16 %v2243_v51  ;;  %v953_v32 = vmul.f32 1.442695, %v835_v48 }
 0x139   :  { %v1069_v47 = vadd.f32 %v1735_v7, %v1733_v11  ;;  %v1741_v1 = vpop.eup %1740  ;;  %v1637_v60 = vunpack.i.h.bf16 %v2875_v36  ;;  %v841_v18 = vmul.f32 10.0, %v765_v19  ;;  %v955_v44 = vmul.f32 1.442695, %v836_v41 }
 0x13a   :  { %1064 = vadd.xlane.f32.xlu0 %v1063_v31  ;;  %v766_v46 = vsub.f32 %v3621_v38, %v1636_v26  ;;  %v3622_v30 = vunpack.c.l.bf16 %v2217_v12  ;;  %v1743_v61 = vpop.eup %1742  ;;  %v949_v33 = vmul.f32 1.442695, %v833_v0  ;;  %1748 = vpow2.f32 %v961_v59 }
 0x13b   :  { %v1745_v51 = vpop.eup %1744  ;;  %v951_v26 = vmul.f32 1.442695, %v834_v37  ;;  %1750 = vpow2.f32 %v963_v28  ;;  %v3623_v9 = vunpack.c.h.bf16 %v2217_v12  ;;  %v3624_v13 = vunpack.c.l.bf16 %v2241_v52  ;;  %v2919_v28 = vpop.permute.xlu2 %1649 }
 0x13c   :  { %v761_v31 = vsub.f32 %v3622_v30, %v1631_v45  ;;  %v842_v36 = vmul.f32 10.0, %v766_v46  ;;  %1752 = vpow2.f32 %v953_v32  ;;  %v965_v29 = vmul.f32 1.442695, %v841_v18 }
 0x13d   :  { %v2900_v58 = vpop.permute.xlu0 %1644  ;;  %v762_v34 = vsub.f32 %v3623_v9, %v1631_v45  ;;  %v1747_v3 = vpop.eup %1746  ;;  %v767_v49 = vsub.f32 %v3624_v13, %v1637_v60  ;;  %1754 = vpow2.f32 %v955_v44  ;;  %v3625_v48 = vunpack.c.l.bf16 %v2263_v23 }
 0x13e   :  { %v2886_v63 = vpop.permute.xlu1 %1639  ;;  %v1647_v6 = vunpack.i.h.bf16 %v2900_v58  ;;  %v837_v15 = vmul.f32 10.0, %v761_v31  ;;  %1756 = vpow2.f32 %v949_v33  ;;  %v1078_v12 = vadd.f32 %v1743_v61, %v1741_v1 }
 0x13f   :  { %v1641_v8 = vunpack.i.l.bf16 %v2886_v63  ;;  %v1642_v50 = vunpack.i.h.bf16 %v2886_v63  ;;  %1758 = vpow2.f32 %v951_v26  ;;  %v838_v17 = vmul.f32 10.0, %v762_v34 }
 0x140   :  { %1073 = vadd.xlane.f32.xlu1 %v1072_v5  ;;  %v775_v7 = vsub.f32 %v3625_v48, %v1647_v6  ;;  %v3626_v63 = vunpack.c.h.bf16 %v2263_v23  ;;  %v1749_v45 = vpop.eup %1748  ;;  %v967_v0 = vmul.f32 1.442695, %v842_v36  ;;  %v3627_v59 = vunpack.c.l.bf16 %v2267_v40 }
 0x141   :  { %v769_v2 = vsub.f32 %v3619_v10, %v1641_v8  ;;  %v770_v25 = vsub.f32 %v3620_v57, %v1641_v8  ;;  %v1057_v8 = vadd.f32 %v1739_v24, %v1737_v35  ;;  %v1751_v5 = vpop.eup %1750  ;;  %v843_v35 = vmul.f32 10.0, %v767_v49 }
 0x142   :  { %1070 = vadd.xlane.f32.xlu0 %v1069_v47  ;;  %v776_v41 = vsub.f32 %v3626_v63, %v1647_v6  ;;  %v771_v10 = vsub.f32 %v3627_v59, %v1642_v50  ;;  %1760 = vpow2.f32 %v965_v29  ;;  %v957_v37 = vmul.f32 1.442695, %v837_v15  ;;  %v1753_v23 = vpop.eup %1752 }
 0x143   :  { %v845_v20 = vmul.f32 10.0, %v769_v2  ;;  %v846_v62 = vmul.f32 10.0, %v770_v25  ;;  %v1075_v2 = vadd.f32 %v1747_v3, %v1745_v51  ;;  %v3628_v57 = vunpack.c.h.bf16 %v2267_v40  ;;  %v1755_v32 = vpop.eup %1754 }
 0x144   :  { %v851_v38 = vmul.f32 10.0, %v775_v7  ;;  %v3629_v47 = vunpack.c.h.bf16 %v2241_v52  ;;  %v959_v18 = vmul.f32 1.442695, %v838_v17  ;;  %v852_v44 = vmul.f32 10.0, %v776_v41  ;;  %v1757_v30 = vpop.eup %1756 }
 0x145   :  { %v973_v11 = vmul.f32 1.442695, %v845_v20  ;;  %v975_v19 = vmul.f32 1.442695, %v846_v62  ;;  %v772_v25 = vsub.f32 %v3628_v57, %v1642_v50  ;;  %v1651_v40 = vunpack.i.l.bf16 %v2919_v28  ;;  %v1759_v33 = vpop.eup %1758 }
 0x146   :  { %1058 = vadd.xlane.f32.xlu2 %v1057_v8  ;;  %v768_v1 = vsub.f32 %v3629_v47, %v1637_v60  ;;  %v847_v31 = vmul.f32 10.0, %v771_v10  ;;  %v1090_v61 = vadd.f32 %v1751_v5, %v1749_v45  ;;  %v969_v20 = vmul.f32 1.442695, %v843_v35 }
 0x147   :  { %1762 = vpow2.f32 %v973_v11  ;;  %v848_v6 = vmul.f32 10.0, %v772_v25  ;;  %v985_v51 = vmul.f32 1.442695, %v851_v38  ;;  %v1646_v26 = vunpack.i.l.bf16 %v2900_v58 }
 0x148   :  { %1079 = vadd.xlane.f32.xlu1 %v1078_v12  ;;  %1764 = vpow2.f32 %v975_v19  ;;  %v3630_v9 = vunpack.c.l.bf16 %v2287_v14  ;;  %v1084_v60 = vadd.f32 %v1755_v32, %v1753_v23  ;;  %v1761_v34 = vpop.eup %1760  ;;  %v844_v62 = vmul.f32 10.0, %v768_v1 }
 0x149   :  { %1766 = vpow2.f32 %v967_v0  ;;  %v987_v36 = vmul.f32 1.442695, %v852_v44  ;;  %v3631_v50 = vunpack.c.h.bf16 %v2287_v14  ;;  %v3632_v49 = vunpack.c.l.bf16 %v2291_v53 }
 0x14a   :  { %1076 = vadd.xlane.f32.xlu0 %v1075_v2  ;;  %1768 = vpow2.f32 %v957_v37  ;;  %v977_v15 = vmul.f32 1.442695, %v847_v31  ;;  %v1081_v58 = vadd.f32 %v1759_v33, %v1757_v30  ;;  %v3633_v48 = vunpack.c.h.bf16 %v2291_v53 }
 0x14b   :  { %1770 = vpow2.f32 %v959_v18  ;;  %v777_v29 = vsub.f32 %v3632_v49, %v1651_v40  ;;  %v979_v12 = vmul.f32 1.442695, %v848_v6  ;;  %v3634_v14 = vunpack.c.l.bf16 %v2265_v21 }
 0x14c   :  { %1772 = vpow2.f32 %v969_v20  ;;  %v778_v7 = vsub.f32 %v3633_v48, %v1651_v40  ;;  %v971_v0 = vmul.f32 1.442695, %v844_v62  ;;  %v3635_v59 = vunpack.c.h.bf16 %v2265_v21 }
 0x14d   :  { %v2934_v3 = vpop.permute.xlu0 %1659  ;;  %v1763_v13 = vpop.eup %1762  ;;  %1774 = vpow2.f32 %v985_v51  ;;  %v773_v19 = vsub.f32 %v3634_v14, %v1646_v26  ;;  %v853_v5 = vmul.f32 10.0, %v777_v29  ;;  %v1652_v57 = vunpack.i.h.bf16 %v2919_v28 }
 0x14e   :  { %v2923_v24 = vpop.permute.xlu1 %1654  ;;  %1091 = vadd.xlane.f32.xlu2 %v1090_v61  ;;  %v1765_v11 = vpop.eup %1764  ;;  %v1662_v41 = vunpack.i.h.bf16 %v2934_v3  ;;  %1776 = vpow2.f32 %v987_v36  ;;  %v774_v10 = vsub.f32 %v3635_v59, %v1646_v26  ;;  %v854_v25 = vmul.f32 10.0, %v778_v7 }
 0x14f   :  { %v1656_v46 = vunpack.i.l.bf16 %v2923_v24  ;;  %v1767_v17 = vpop.eup %1766  ;;  %1778 = vpow2.f32 %v977_v15  ;;  %v1657_v53 = vunpack.i.h.bf16 %v2923_v24  ;;  %v1099_v35 = vadd.f32 %v1765_v11, %v1763_v13 }
 0x150   :  { %1085 = vadd.xlane.f32.xlu1 %v1084_v60  ;;  %v1769_v45 = vpop.eup %1768  ;;  %1780 = vpow2.f32 %v979_v12  ;;  %v849_v23 = vmul.f32 10.0, %v773_v19  ;;  %v1093_v47 = vadd.f32 %v1767_v17, %v1761_v34  ;;  %v850_v1 = vmul.f32 10.0, %v774_v10 }
 0x151   :  { %v781_v52 = vsub.f32 %v3630_v9, %v1656_v46  ;;  %v782_v8 = vsub.f32 %v3631_v50, %v1656_v46  ;;  %v1771_v37 = vpop.eup %1770  ;;  %v3636_v46 = vunpack.c.l.bf16 %v2311_v56  ;;  %1782 = vpow2.f32 %v971_v0 }
 0x152   :  { %1082 = vadd.xlane.f32.xlu0 %v1081_v58  ;;  %v1773_v21 = vpop.eup %1772  ;;  %v3637_v44 = vunpack.c.h.bf16 %v2311_v56  ;;  %v989_v40 = vmul.f32 1.442695, %v853_v5  ;;  %v3638_v28 = vunpack.c.l.bf16 %v2315_v42  ;;  %v1087_v61 = vadd.f32 %v1771_v37, %v1769_v45 }
 0x153   :  { %v857_v63 = vmul.f32 10.0, %v781_v52  ;;  %v858_v2 = vmul.f32 10.0, %v782_v8  ;;  %v787_v32 = vsub.f32 %v3636_v46, %v1662_v41  ;;  %v1775_v30 = vpop.eup %1774  ;;  %v3639_v20 = vsub.f32 %v2364_v39, %v2373_v43 }
 0x154   :  { %v788_v24 = vsub.f32 %v3637_v44, %v1662_v41  ;;  %v783_v31 = vsub.f32 %v3638_v28, %v1657_v53  ;;  %v1777_v33 = vpop.eup %1776  ;;  %v991_v51 = vmul.f32 1.442695, %v854_v25  ;;  %v3640_v26 = vunpack.c.h.bf16 %v2315_v42  ;;  %v3646_v28 = vld [vmem:[#allocation20_spill] sm:$0xff] }
 0x155   :  { %v997_v38 = vmul.f32 1.442695, %v857_v63  ;;  %v999_v18 = vmul.f32 1.442695, %v858_v2  ;;  %v413_v6 = vmul.f32 10.0, %v3639_v20  ;;  %v1779_v52 = vpop.eup %1778  ;;  %v3641_v56 = vunpack.c.l.bf16 %v2289_v54 }
 0x156   :  { %1100 = vadd.xlane.f32.xlu2 %v1099_v35  ;;  %v784_v9 = vsub.f32 %v3640_v26, %v1657_v53  ;;  %v981_v34 = vmul.f32 1.442695, %v849_v23  ;;  %v863_v62 = vmul.f32 10.0, %v787_v32  ;;  %v1781_v36 = vpop.eup %1780  ;;  %v3642_v50 = vunpack.c.h.bf16 %v2289_v54 }
 0x157   :  { %v779_v60 = vsub.f32 %v3641_v56, %v1652_v57  ;;  %1784 = vpow2.f32 %v997_v38  ;;  %v983_v13 = vmul.f32 1.442695, %v850_v1  ;;  %v864_v49 = vmul.f32 10.0, %v788_v24  ;;  %v1783_v42 = vpop.eup %1782 }
 0x158   :  { %1094 = vadd.xlane.f32.xlu1 %v1093_v47  ;;  %v780_v8 = vsub.f32 %v3642_v50, %v1652_v57  ;;  %1786 = vpow2.f32 %v999_v18  ;;  %v859_v29 = vmul.f32 10.0, %v783_v31  ;;  %v1108_v15 = vadd.f32 %v1777_v33, %v1775_v30  ;;  %v3647_v31 = vld [vmem:[#allocation23_spill] sm:$0xff] }
 0x159   :  { %1788 = vpow2.f32 %v989_v40  ;;  %v451_v58 = vmul.f32 1.442695, %v413_v6  ;;  %v860_v11 = vmul.f32 10.0, %v784_v9  ;;  %v1661_v48 = vunpack.i.l.bf16 %v2934_v3  ;;  %v3649_v50 = vld [vmem:[#allocation15_spill] sm:$0xff] }
 0x15a   :  { %1088 = vadd.xlane.f32.xlu0 %v1087_v61  ;;  %1790 = vpow2.f32 %v991_v51  ;;  %v855_v7 = vmul.f32 10.0, %v779_v60  ;;  %v1009_v12 = vmul.f32 1.442695, %v863_v62  ;;  %v1102_v17 = vadd.f32 %v1781_v36, %v1779_v52 }
 0x15b   :  { %1792 = vpow2.f32 %v981_v34  ;;  %v856_v14 = vmul.f32 10.0, %v780_v8  ;;  %v1011_v54 = vmul.f32 1.442695, %v864_v49  ;;  %v1001_v63 = vmul.f32 1.442695, %v859_v29  ;;  %v3650_v8 = vld [vmem:[#allocation17_spill] sm:$0xff] }
 0x15c   :  { %1794 = vpow2.f32 %v983_v13  ;;  %v1096_v41 = vadd.f32 %v1783_v42, %v1773_v21  ;;  %v1003_v0 = vmul.f32 1.442695, %v860_v11  ;;  %v3643_v59 = vunpack.c.l.bf16 %v2313_v27 }
 0x15d   :  { %v1785_v19 = vpop.eup %1784  ;;  %1796 = vpow2.f32 %v451_v58  ;;  %v993_v3 = vmul.f32 1.442695, %v855_v7  ;;  %v995_v53 = vmul.f32 1.442695, %v856_v14  ;;  %v3644_v35 = vunpack.c.h.bf16 %v2313_v27  ;;  %v3653_v14 = vld [vmem:[#allocation11_spill] sm:$0xff] }
 0x15e   :  { %1109 = vadd.xlane.f32.xlu2 %v1108_v15  ;;  %v1787_v45 = vpop.eup %1786  ;;  %v785_v10 = vsub.f32 %v3643_v59, %v1661_v48  ;;  %1798 = vpow2.f32 %v1009_v12  ;;  %v3645_v25 = vsub.f32 %v2391_v4, %v2400_v22  ;;  %v3648_v61 = vsub.f32 %v3646_v28, %v3647_v31 }
 0x15f   :  { %v1789_v2 = vpop.eup %1788  ;;  %1800 = vpow2.f32 %v1011_v54  ;;  %v786_v37 = vsub.f32 %v3644_v35, %v1661_v48  ;;  %v1117_v38 = vadd.f32 %v1787_v45, %v1785_v19  ;;  %v3651_v13 = vsub.f32 %v3649_v50, %v3650_v8  ;;  %v3654_v54 = vld [vmem:[#allocation13_spill] sm:$0xff]  ;;  %v3660_v35 = vld [vmem:[#allocation12_spill] sm:$0xff] }
 0x160   :  { %1103 = vadd.xlane.f32.xlu1 %v1102_v17  ;;  %v1791_v5 = vpop.eup %1790  ;;  %v414_v23 = vmul.f32 10.0, %v3645_v25  ;;  %1802 = vpow2.f32 %v1001_v63  ;;  %v861_v32 = vmul.f32 10.0, %v785_v10  ;;  %v419_v33 = vmul.f32 10.0, %v3648_v61  ;;  %v3656_v10 = vld [vmem:[#allocation19_spill] sm:$0xff] }
 0x161   :  { %v1793_v57 = vpop.eup %1792  ;;  %1804 = vpow2.f32 %v1003_v0  ;;  %v1111_v47 = vadd.f32 %v1791_v5, %v1789_v2  ;;  %v862_v1 = vmul.f32 10.0, %v786_v37  ;;  %v416_v49 = vmul.f32 10.0, %v3651_v13  ;;  %v3657_v2 = vld [vmem:[#allocation22_spill] sm:$0xff] }
 0x162   :  { %1097 = vadd.xlane.f32.xlu0 %v1096_v41  ;;  %v1795_v46 = vpop.eup %1794  ;;  %1806 = vpow2.f32 %v993_v3  ;;  %v453_v44 = vmul.f32 1.442695, %v414_v23  ;;  %v1005_v30 = vmul.f32 1.442695, %v861_v32  ;;  %v463_v60 = vmul.f32 1.442695, %v419_v33 }
 0x163   :  { %v1797_v21 = vpop.eup %1796  ;;  %1808 = vpow2.f32 %v995_v53  ;;  %v1105_v27 = vadd.f32 %v1795_v46, %v1793_v57  ;;  %v1007_v6 = vmul.f32 1.442695, %v862_v1  ;;  %v3652_v11 = vsub.f32 %v2373_v43, %v2364_v39  ;;  %v3659_v39 = vld [vmem:[#allocation10_spill] sm:$0xff] }
 0x164   :  { %v1799_v18 = vpop.eup %1798  ;;  %1810 = vpow2.f32 %v453_v44  ;;  %v457_v17 = vmul.f32 1.442695, %v416_v49  ;;  %v3655_v19 = vsub.f32 %v3653_v14, %v3654_v54  ;;  %v3658_v3 = vsub.f32 %v3656_v10, %v3657_v2  ;;  %v3663_v32 = vld [vmem:[#allocation26_spill] sm:$0xff] }
 0x165   :  { %v1801_v24 = vpop.eup %1800  ;;  %1812 = vpow2.f32 %v1005_v30  ;;  %v1287_v48 = vmul.f32 10.0, %v3652_v11  ;;  %v3661_v37 = vsub.f32 %v3659_v39, %v3660_v35 }
 0x166   :  { %1118 = vadd.xlane.f32.xlu2 %v1117_v38  ;;  %v1803_v40 = vpop.eup %1802  ;;  %v1126_v9 = vadd.f32 %v1801_v24, %v1799_v18  ;;  %v415_v63 = vmul.f32 10.0, %v3655_v19  ;;  %v420_v5 = vmul.f32 10.0, %v3658_v3  ;;  %v3662_v38 = vsub.f32 %v2400_v22, %v2391_v4  ;;  %v3674_v19 = vld [vmem:[#allocation16_spill] sm:$0xff] }
 0x167   :  { %v1805_v20 = vpop.eup %1804  ;;  %v417_v57 = vmul.f32 10.0, %v3661_v37  ;;  %v3666_v24 = vsub.f32 %v3647_v31, %v3646_v28 }
 0x168   :  { %1112 = vadd.xlane.f32.xlu1 %v1111_v47  ;;  %v1807_v26 = vpop.eup %1806  ;;  %v1120_v34 = vadd.f32 %v1805_v20, %v1803_v40  ;;  %v455_v43 = vmul.f32 1.442695, %v415_v63  ;;  %v465_v23 = vmul.f32 1.442695, %v420_v5  ;;  %v1288_v46 = vmul.f32 10.0, %v3662_v38  ;;  %v3664_v47 = vld [vmem:[#allocation29_spill] sm:$0xff] }
 0x169   :  { %v1809_v56 = vpop.eup %1808  ;;  %v1293_v30 = vmul.f32 10.0, %v3666_v24 }
 0x16a   :  { %1106 = vadd.xlane.f32.xlu0 %v1105_v27  ;;  %v1114_v62 = vadd.f32 %v1809_v56, %v1807_v26  ;;  %v1811_v36 = vpop.eup %1810  ;;  %v459_v27 = vmul.f32 1.442695, %v417_v57 }
 0x16b   :  { %v1813_v29 = vpop.eup %1812 }
 0x16e   :  { %1127 = vadd.xlane.f32.xlu2 %v1126_v9 }
 0x170   :  { %v1023_v51 = vpop.xlane.xlu2 %1022  ;;  %1121 = vadd.xlane.f32.xlu1 %v1120_v34 }
 0x171   :  { %v1135_v52 = vadd.f32 %v1797_v21, %v1023_v51  ;;  %v3665_v21 = vsub.f32 %v3663_v32, %v3664_v47 }
 0x172   :  { %1115 = vadd.xlane.f32.xlu0 %v1114_v62 }
 0x173   :  { %1814 = vlog2.f32 %v1135_v52  ;;  %v422_v1 = vmul.f32 10.0, %v3665_v21  ;;  %v3677_v21 = vld [vmem:[#allocation25_spill] sm:$0xff] }
 0x174   :  { %1816 = vpow2.f32 %v1007_v6 }
 0x175   :  { %1818 = vpow2.f32 %v463_v60  ;;  %v469_v51 = vmul.f32 1.442695, %v422_v1  ;;  %v3667_v60 = vld [vmem:[#allocation8_spill] sm:$0xff] }
 0x176   :  { %v3668_v34 = vunpack.c.l.bf16 %v3667_v60  ;;  %v3669_v31 = vunpack.c.h.bf16 %v3667_v60  ;;  %v3678_v1 = vld [vmem:[#allocation28_spill] sm:$0xff] }
 0x178   :  { %v1041_v59 = vpop.xlane.xlu2 %1040 }
 0x179   :  { %v1815_v15 = vpop.eup %1814  ;;  %v1026_v42 = vpop.xlane.xlu1 %1025 }
 0x17a   :  { %v1817_v58 = vpop.eup %1816  ;;  %v1174_v7 = vmul.f32 0.6931472, %v1815_v15  ;;  %v1136_v12 = vadd.f32 %v1811_v36, %v1026_v42  ;;  %v3670_v36 = vld [vmem:[#allocation9_spill] sm:$0xff] }
 0x17b   :  { %v1819_v45 = vpop.eup %1818  ;;  %v1123_v0 = vadd.f32 %v1817_v58, %v1813_v29  ;;  %v3671_v13 = vunpack.c.l.bf16 %v3670_v36  ;;  %v3672_v15 = vunpack.c.h.bf16 %v3670_v36 }
 0x17c   :  { %v1325_v41 = vadd.f32 %v1287_v48, %v1174_v7  ;;  %1820 = vlog2.f32 %v1136_v12  ;;  %v1141_v53 = vadd.f32 %v1819_v45, %v1041_v59 }
 0x17d   :  { %1822 = vpow2.f32 %v457_v17  ;;  %1124 = vadd.xlane.f32.xlu0 %v1123_v0  ;;  %v3673_v17 = vld [vmem:[#allocation14_spill] sm:$0xff] }
 0x17e   :  { %1824 = vlog2.f32 %v1141_v53  ;;  %v1364_v26 = vsel %vm1363_vm0, %v1325_v41, 0.0  ;;  %v3675_v63 = vsub.f32 %v3673_v17, %v3674_v19 }
 0x17f   :  { %1826 = vpow2.f32 %v455_v43 }
 0x180   :  { %v1665_v61 = vpop.permute.xlu2 %1664  ;;  %1828 = vpow2.f32 %v465_v23  ;;  %v418_v41 = vmul.f32 10.0, %v3675_v63  ;;  %v3676_v23 = vsub.f32 %v3650_v8, %v3649_v50 }
 0x181   :  { %v1667_v4 = vunpack.i.h.bf16 %v1665_v61  ;;  %v1666_v22 = vunpack.i.l.bf16 %v1665_v61 }
 0x182   :  { %v1821_v25 = vpop.eup %1820  ;;  %v1290_v38 = vmul.f32 10.0, %v3676_v23 }
 0x183   :  { %v1176_v18 = vmul.f32 0.6931472, %v1821_v25  ;;  %v1823_v44 = vpop.eup %1822  ;;  %v1032_v33 = vpop.xlane.xlu1 %1031  ;;  %v791_v28 = vsub.f32 %v3668_v34, %v1667_v4  ;;  %v792_v62 = vsub.f32 %v3669_v31, %v1667_v4  ;;  %v789_v49 = vsub.f32 %v3671_v13, %v1666_v22  ;;  %v3681_v4 = vld [vmem:[#allocation21_spill] sm:$0xff] }
 0x184   :  { %v1825_v20 = vpop.eup %1824  ;;  %v1138_v6 = vadd.f32 %v1823_v44, %v1032_v33  ;;  %v790_v42 = vsub.f32 %v3672_v15, %v1666_v22 }
 0x185   :  { %v1326_v40 = vadd.f32 %v1288_v46, %v1176_v18  ;;  %v1186_v9 = vmul.f32 0.6931472, %v1825_v20  ;;  %v1827_v58 = vpop.eup %1826  ;;  %v867_v11 = vmul.f32 10.0, %v791_v28  ;;  %v868_v48 = vmul.f32 10.0, %v792_v62  ;;  %v1029_v12 = vpop.xlane.xlu0 %1028  ;;  %v3680_v20 = vld [vmem:[#allocation18_spill] sm:$0xff] }
 0x186   :  { %1830 = vlog2.f32 %v1138_v6  ;;  %v865_v7 = vmul.f32 10.0, %v789_v49  ;;  %v866_v45 = vmul.f32 10.0, %v790_v42  ;;  %v1137_v0 = vadd.f32 %v1827_v58, %v1029_v12  ;;  %v1829_v59 = vpop.eup %1828  ;;  %v3684_v42 = vld [vmem:[#allocation31_spill] sm:$0xff]  ;;  %v3685_v58 = vld [vmem:[#allocation34_spill] sm:$0xff] }
 0x187   :  { %v1365_v52 = vsel %vm1363_vm0, %v1326_v40, 0.0  ;;  %v3007_v29 = vadd.f32 %v1293_v30, %v1186_v9  ;;  %1832 = vpow2.f32 %v459_v27  ;;  %v1017_v3 = vmul.f32 1.442695, %v867_v11 }
 0x188   :  { %v2999_v56 = vadd.f32 %v1365_v52, %v1364_v26  ;;  %1834 = vpow2.f32 %v469_v51  ;;  %v1019_v5 = vmul.f32 1.442695, %v868_v48  ;;  %v1013_v53 = vmul.f32 1.442695, %v865_v7 }
 0x189   :  { %v1015_v43 = vmul.f32 1.442695, %v866_v45  ;;  %1836 = vlog2.f32 %v1137_v0  ;;  %v461_v46 = vmul.f32 1.442695, %v418_v41  ;;  %v3679_v18 = vsub.f32 %v3677_v21, %v3678_v1 }
 0x18a   :  { %1838 = vpow2.f32 %v1017_v3  ;;  %v3682_v22 = vsub.f32 %v3680_v20, %v3681_v4  ;;  %v3683_v51 = vsub.f32 %v3654_v54, %v3653_v14  ;;  %v3686_v11 = vsub.f32 %v3684_v42, %v3685_v58 }
 0x18b   :  { %v1044_v37 = vpop.xlane.xlu1 %1043  ;;  %1840 = vpow2.f32 %v1019_v5  ;;  %v423_v44 = vmul.f32 10.0, %v3679_v18  ;;  %v3687_v7 = vsub.f32 %v3657_v2, %v3656_v10  ;;  %v3688_v5 = vsub.f32 %v3660_v35, %v3659_v39  ;;  %v3689_v10 = vld [vmem:[#allocation24_spill] sm:$0xff]  ;;  %v3690_v2 = vld [vmem:[#allocation27_spill] sm:$0xff] }
 0x18c   :  { %v1142_v57 = vadd.f32 %v1829_v59, %v1044_v37  ;;  %v1831_v25 = vpop.eup %1830  ;;  %1842 = vpow2.f32 %v1013_v53  ;;  %v421_v50 = vmul.f32 10.0, %v3682_v22  ;;  %v1289_v26 = vmul.f32 10.0, %v3683_v51 }
 0x18d   :  { %v1180_v27 = vmul.f32 0.6931472, %v1831_v25  ;;  %v1833_v24 = vpop.eup %1832  ;;  %1844 = vpow2.f32 %v1015_v43  ;;  %v1035_v61 = vpop.xlane.xlu0 %1034  ;;  %v471_v9 = vmul.f32 1.442695, %v423_v44  ;;  %v426_v48 = vmul.f32 10.0, %v3686_v11 }
 0x18e   :  { %v1835_v30 = vpop.eup %1834  ;;  %1846 = vlog2.f32 %v1142_v57  ;;  %v1139_v8 = vadd.f32 %v1833_v24, %v1035_v61  ;;  %v467_v13 = vmul.f32 1.442695, %v421_v50  ;;  %v1294_v12 = vmul.f32 10.0, %v3687_v7  ;;  %v3693_v50 = vld [vmem:[#allocation38_spill] sm:$0xff] }
 0x18f   :  { %v1328_v40 = vadd.f32 %v1290_v38, %v1180_v27  ;;  %v1837_v33 = vpop.eup %1836  ;;  %1848 = vpow2.f32 %v461_v46  ;;  %v1291_v53 = vmul.f32 10.0, %v3688_v5  ;;  %v3691_v25 = vsub.f32 %v3689_v10, %v3690_v2 }
 0x190   :  { %v1839_v6 = vpop.eup %1838  ;;  %v1178_v52 = vmul.f32 0.6931472, %v1837_v33  ;;  %1850 = vlog2.f32 %v1139_v8  ;;  %v477_v23 = vmul.f32 1.442695, %v426_v48  ;;  %v3692_v24 = vsub.f32 %v3664_v47, %v3663_v32  ;;  %v3694_v8 = vld [vmem:[#allocation41_spill] sm:$0xff] }
 0x191   :  { %v1841_v60 = vpop.eup %1840  ;;  %1852 = vpow2.f32 %v471_v9  ;;  %v1369_v0 = vsel %vm1363_vm0, %v1328_v40, 0.0  ;;  %v3696_v32 = vsub.f32 %v3674_v19, %v3673_v17  ;;  %v1375_v5 = vsel %vm1363_vm0, %v3007_v29, 0.0 }
 0x192   :  { %v1843_v34 = vpop.eup %1842  ;;  %v1327_v28 = vadd.f32 %v1289_v26, %v1178_v52  ;;  %v1132_v31 = vadd.f32 %v1841_v60, %v1839_v6  ;;  %v1296_v39 = vmul.f32 10.0, %v3692_v24  ;;  %v3695_v6 = vsub.f32 %v3693_v50, %v3694_v8 }
 0x193   :  { %v1050_v62 = vpop.xlane.xlu1 %1049  ;;  %v1845_v36 = vpop.eup %1844  ;;  %v1292_v47 = vmul.f32 10.0, %v3696_v32 }
 0x194   :  { %v1144_v49 = vadd.f32 %v1835_v30, %v1050_v62  ;;  %v1847_v15 = vpop.eup %1846  ;;  %v1367_v14 = vsel %vm1363_vm0, %v1327_v28, 0.0  ;;  %1133 = vadd.xlane.f32.xlu0 %v1132_v31  ;;  %v1129_v54 = vadd.f32 %v1845_v36, %v1843_v34  ;;  %v428_v51 = vmul.f32 10.0, %v3695_v6  ;;  %v3697_v34 = vld [vmem:[#allocation30_spill] sm:$0xff]  ;;  %v3698_v28 = vld [vmem:[#allocation33_spill] sm:$0xff] }
 0x195   :  { %v1368_v63 = vadd.f32 %v1367_v14, %v2999_v56  ;;  %v1188_v41 = vmul.f32 0.6931472, %v1847_v15  ;;  %v1849_v45 = vpop.eup %1848  ;;  %v1038_v59 = vpop.xlane.xlu0 %1037  ;;  %v424_v56 = vmul.f32 10.0, %v3691_v25  ;;  %v3699_v31 = vsub.f32 %v3697_v34, %v3698_v28 }
 0x196   :  { %1854 = vlog2.f32 %v1144_v49  ;;  %1130 = vadd.xlane.f32.xlu1 %v1129_v54  ;;  %v1851_v3 = vpop.eup %1850  ;;  %v1140_v57 = vadd.f32 %v1849_v45, %v1038_v59  ;;  %v481_v49 = vmul.f32 1.442695, %v428_v51  ;;  %v3700_v54 = vsub.f32 %v3678_v1, %v3677_v21  ;;  %v3701_v45 = vld [vmem:[#allocation36_spill] sm:$0xff] }
 0x197   :  { %v1370_v43 = vadd.f32 %v1369_v0, %v1368_v63  ;;  %v1332_v37 = vadd.f32 %v1294_v12, %v1188_v41  ;;  %1856 = vpow2.f32 %v467_v13  ;;  %v1182_v38 = vmul.f32 0.6931472, %v1851_v3  ;;  %v1853_v46 = vpop.eup %1852  ;;  %v3702_v0 = vld [vmem:[#allocation39_spill] sm:$0xff] }
 0x198   :  { %1858 = vlog2.f32 %v1140_v57  ;;  %v473_v30 = vmul.f32 1.442695, %v424_v56  ;;  %v427_v62 = vmul.f32 10.0, %v3699_v31  ;;  %v1297_v7 = vmul.f32 10.0, %v3700_v54 }
 0x199   :  { %v1329_v18 = vadd.f32 %v1291_v53, %v1182_v38  ;;  %1860 = vpow2.f32 %v477_v23  ;;  %v3703_v59 = vsub.f32 %v3701_v45, %v3702_v0  ;;  %v3704_v21 = vsub.f32 %v3681_v4, %v3680_v20  ;;  %v3705_v23 = vld [vmem:[#allocation37_spill] sm:$0xff]  ;;  %v3706_v38 = vld [vmem:[#allocation40_spill] sm:$0xff] }
 0x19a   :  { %v479_v12 = vmul.f32 1.442695, %v427_v62  ;;  %v3713_v62 = vld [vmem:[#allocation43_spill] sm:$0xff] }
 0x19b   :  { %v1053_v44 = vpop.xlane.xlu1 %1052  ;;  %v1371_v40 = vsel %vm1363_vm0, %v1329_v18, 0.0  ;;  %v430_v3 = vmul.f32 10.0, %v3703_v59  ;;  %v1295_v1 = vmul.f32 10.0, %v3704_v21 }
 0x19c   :  { %v1855_v27 = vpop.eup %1854  ;;  %v1145_v35 = vadd.f32 %v1853_v46, %v1053_v44  ;;  %v1372_v33 = vadd.f32 %v1371_v40, %v1370_v43  ;;  %v3707_v46 = vsub.f32 %v3705_v23, %v3706_v38  ;;  %v1377_v44 = vsel %vm1363_vm0, %v1332_v37, 0.0  ;;  %v3709_v40 = vld [vmem:[#allocation35_spill] sm:$0xff] }
 0x19d   :  { %v1192_v61 = vmul.f32 0.6931472, %v1855_v27  ;;  %v1857_v22 = vpop.eup %1856  ;;  %v1047_v9 = vpop.xlane.xlu0 %1046  ;;  %v485_v29 = vmul.f32 1.442695, %v430_v3 }
 0x19e   :  { %1862 = vlog2.f32 %v1145_v35  ;;  %v1859_v52 = vpop.eup %1858  ;;  %v1143_v60 = vadd.f32 %v1857_v22, %v1047_v9  ;;  %v429_v18 = vmul.f32 10.0, %v3707_v46 }
 0x19f   :  { %v1334_v26 = vadd.f32 %v1296_v39, %v1192_v61  ;;  %1864 = vpow2.f32 %v473_v30  ;;  %v1184_v36 = vmul.f32 0.6931472, %v1859_v52  ;;  %v1861_v13 = vpop.eup %1860  ;;  %v3708_v30 = vld [vmem:[#allocation32_spill] sm:$0xff]  ;;  %v3712_v52 = vsub.f32 %v3690_v2, %v3689_v10  ;;  %v3717_v2 = vld [vmem:[#allocation47_spill] sm:$0xff] }
 0x1a0   :  { %1866 = vlog2.f32 %v1143_v60  ;;  %v3710_v61 = vsub.f32 %v3708_v30, %v3709_v40  ;;  %v483_v6 = vmul.f32 1.442695, %v429_v18  ;;  %v3716_v10 = vld [vmem:[#allocation44_spill] sm:$0xff] }
 0x1a1   :  { %v1330_v15 = vadd.f32 %v1292_v47, %v1184_v36  ;;  %v1298_v60 = vmul.f32 10.0, %v3712_v52  ;;  %v3714_v36 = vld [vmem:[#allocation46_spill] sm:$0xff] }
 0x1a2   :  { %v425_v20 = vmul.f32 10.0, %v3710_v61 }
 0x1a3   :  { %v1062_v11 = vpop.xlane.xlu1 %1061  ;;  %v1373_v17 = vsel %vm1363_vm0, %v1330_v15, 0.0 }
 0x1a4   :  { %v1863_v48 = vpop.eup %1862  ;;  %v1148_v14 = vadd.f32 %v1861_v13, %v1062_v11  ;;  %v1374_v63 = vadd.f32 %v1373_v17, %v1372_v33  ;;  %v3711_v33 = vsub.f32 %v3685_v58, %v3684_v42  ;;  %v3715_v13 = vsub.f32 %v3713_v62, %v3714_v36 }
 0x1a5   :  { %v1194_v19 = vmul.f32 0.6931472, %v1863_v48  ;;  %v1865_v41 = vpop.eup %1864  ;;  %v1056_v43 = vpop.xlane.xlu0 %1055  ;;  %v1381_v42 = vsel %vm1363_vm0, %v1334_v26, 0.0  ;;  %v475_v48 = vmul.f32 1.442695, %v425_v20 }
 0x1a6   :  { %1868 = vlog2.f32 %v1148_v14  ;;  %v1867_v57 = vpop.eup %1866  ;;  %v1376_v25 = vadd.f32 %v1375_v5, %v1374_v63  ;;  %v1146_v56 = vadd.f32 %v1865_v41, %v1056_v43  ;;  %v1300_v22 = vmul.f32 10.0, %v3711_v33  ;;  %v3719_v5 = vld [vmem:[#allocation48_spill] sm:$0xff]  ;;  %v3720_v43 = vld [vmem:[#allocation51_spill] sm:$0xff] }
 0x1a7   :  { %1870 = vpow2.f32 %v481_v49  ;;  %v1335_v53 = vadd.f32 %v1297_v7, %v1194_v19  ;;  %v1190_v27 = vmul.f32 0.6931472, %v1867_v57  ;;  %v432_v49 = vmul.f32 10.0, %v3715_v13 }
 0x1a8   :  { %1872 = vpow2.f32 %v479_v12  ;;  %v1378_v24 = vadd.f32 %v1377_v44, %v1376_v25  ;;  %v3718_v7 = vsub.f32 %v3716_v10, %v3717_v2  ;;  %v3721_v57 = vsub.f32 %v3719_v5, %v3720_v43 }
 0x1a9   :  { %1874 = vlog2.f32 %v1146_v56  ;;  %v1333_v39 = vadd.f32 %v1295_v1, %v1190_v27  ;;  %v1383_v17 = vsel %vm1363_vm0, %v1335_v53, 0.0  ;;  %v489_v41 = vmul.f32 1.442695, %v432_v49  ;;  %v3730_v49 = vld [vmem:[#allocation49_spill] sm:$0xff] }
 0x1aa   :  { %1876 = vpow2.f32 %v485_v29  ;;  %v431_v12 = vmul.f32 10.0, %v3718_v7  ;;  %v436_v21 = vmul.f32 10.0, %v3721_v57  ;;  %v3722_v44 = vsub.f32 %v3694_v8, %v3693_v50  ;;  %v3724_v29 = vld [vmem:[#allocation53_spill] sm:$0xff]  ;;  %v3738_v57 = vld [vmem:[#allocation59_spill] sm:$0xff] }
 0x1ab   :  { %v1379_v51 = vsel %vm1363_vm0, %v1333_v39, 0.0  ;;  %v1068_v37 = vpop.xlane.xlu1 %1067  ;;  %v3726_v33 = vsub.f32 %v3698_v28, %v3697_v34  ;;  %v3731_v34 = vld [vmem:[#allocation52_spill] sm:$0xff] }
 0x1ac   :  { %v1869_v35 = vpop.eup %1868  ;;  %v1380_v32 = vadd.f32 %v1379_v51, %v1378_v24  ;;  %v487_v3 = vmul.f32 1.442695, %v431_v12  ;;  %v1302_v27 = vmul.f32 10.0, %v3722_v44  ;;  %v3723_v24 = vld [vmem:[#allocation50_spill] sm:$0xff]  ;;  %v3728_v51 = vld [vmem:[#allocation45_spill] sm:$0xff]  ;;  %v3732_v28 = vsub.f32 %v3730_v49, %v3731_v34 }
 0x1ad   :  { %v1871_v4 = vpop.eup %1870  ;;  %v1200_v9 = vmul.f32 0.6931472, %v1869_v35  ;;  %v1065_v15 = vpop.xlane.xlu0 %1064  ;;  %v3725_v39 = vsub.f32 %v3723_v24, %v3724_v29  ;;  %v497_v50 = vmul.f32 1.442695, %v436_v21 }
 0x1ae   :  { %v1150_v47 = vadd.f32 %v1871_v4, %v1068_v37  ;;  %v1873_v31 = vpop.eup %1872  ;;  %v1382_v14 = vadd.f32 %v1381_v42, %v1380_v32  ;;  %v435_v42 = vmul.f32 10.0, %v3732_v28 }
 0x1af   :  { %v3084_v58 = vadd.f32 %v1300_v22, %v1200_v9  ;;  %v1875_v11 = vpop.eup %1874  ;;  %v1149_v54 = vadd.f32 %v1873_v31, %v1065_v15  ;;  %v434_v35 = vmul.f32 10.0, %v3725_v39  ;;  %v1301_v22 = vmul.f32 10.0, %v3726_v33 }
 0x1b0   :  { %1878 = vlog2.f32 %v1150_v47  ;;  %v1196_v19 = vmul.f32 0.6931472, %v1875_v11  ;;  %v1384_v63 = vadd.f32 %v1383_v17, %v1382_v14  ;;  %v1877_v59 = vpop.eup %1876  ;;  %v3733_v14 = vld [vmem:[#allocation54_spill] sm:$0xff] }
 0x1b1   :  { %1880 = vpow2.f32 %v483_v6  ;;  %v3727_v6 = vld [vmem:[#allocation42_spill] sm:$0xff]  ;;  %v493_v47 = vmul.f32 1.442695, %v434_v35 }
 0x1b2   :  { %1882 = vlog2.f32 %v1149_v54  ;;  %v1336_v26 = vadd.f32 %v1298_v60, %v1196_v19  ;;  %v3729_v9 = vsub.f32 %v3727_v6, %v3728_v51  ;;  %v3734_v54 = vld [vmem:[#allocation57_spill] sm:$0xff] }
 0x1b3   :  { %1884 = vpow2.f32 %v475_v48  ;;  %v1074_v25 = vpop.xlane.xlu1 %1073  ;;  %v3735_v7 = vsub.f32 %v3733_v14, %v3734_v54 }
 0x1b4   :  { %v1385_v1 = vsel %vm1363_vm0, %v1336_v26, 0.0  ;;  %v1152_v18 = vadd.f32 %v1877_v59, %v1074_v25  ;;  %1886 = vpow2.f32 %v489_v41  ;;  %v433_v37 = vmul.f32 10.0, %v3729_v9  ;;  %v3741_v9 = vld [vmem:[#allocation55_spill] sm:$0xff] }
 0x1b5   :  { %v3094_v46 = vadd.f32 %v1385_v1, %v1384_v63  ;;  %v1071_v20 = vpop.xlane.xlu0 %1070  ;;  %v439_v12 = vmul.f32 10.0, %v3735_v7  ;;  %v3736_v26 = vsub.f32 %v3702_v0, %v3701_v45  ;;  %v3748_v7 = vsub.f32 %v3728_v51, %v3727_v6 }
 0x1b6   :  { %v1879_v56 = vpop.eup %1878  ;;  %1888 = vlog2.f32 %v1152_v18  ;;  %v491_v48 = vmul.f32 1.442695, %v433_v37  ;;  %v3742_v37 = vld [vmem:[#allocation58_spill] sm:$0xff]  ;;  %v3753_v6 = vsub.f32 %v3717_v2, %v3716_v10 }
 0x1b7   :  { %v1881_v53 = vpop.eup %1880  ;;  %v1204_v61 = vmul.f32 0.6931472, %v1879_v56  ;;  %1890 = vpow2.f32 %v487_v3  ;;  %v1304_v59 = vmul.f32 10.0, %v3736_v26  ;;  %v3737_v3 = vld [vmem:[#allocation56_spill] sm:$0xff]  ;;  %v503_v35 = vmul.f32 1.442695, %v439_v12 }
 0x1b8   :  { %v1883_v4 = vpop.eup %1882  ;;  %v1151_v52 = vadd.f32 %v1881_v53, %v1071_v20  ;;  %v3739_v21 = vsub.f32 %v3737_v3, %v3738_v57  ;;  %v3740_v53 = vsub.f32 %v3706_v38, %v3705_v23  ;;  %v3743_v23 = vsub.f32 %v3741_v9, %v3742_v37 }
 0x1b9   :  { %v1202_v8 = vmul.f32 0.6931472, %v1883_v4  ;;  %v3108_v60 = vadd.f32 %v1302_v27, %v1204_v61  ;;  %v1885_v32 = vpop.eup %1884  ;;  %v1059_v13 = vpop.xlane.xlu2 %1058  ;;  %v495_v27 = vmul.f32 1.442695, %v435_v42  ;;  %v3143_v12 = vmul.f32 10.0, %v3748_v7  ;;  %v3762_v7 = vld [vmem:[#allocation68_spill] sm:$0xff] }
 0x1ba   :  { %1892 = vlog2.f32 %v1151_v52  ;;  %v1147_v15 = vadd.f32 %v1885_v32, %v1059_v13  ;;  %v1887_v11 = vpop.eup %1886  ;;  %v437_v1 = vmul.f32 10.0, %v3739_v21  ;;  %v1303_v44 = vmul.f32 10.0, %v3740_v53  ;;  %v3746_v13 = vld [vmem:[#allocation63_spill] sm:$0xff] }
 0x1bb   :  { %v3110_v31 = vadd.f32 %v1301_v22, %v1202_v8  ;;  %1894 = vpow2.f32 %v497_v50  ;;  %v1080_v17 = vpop.xlane.xlu1 %1079  ;;  %v438_v38 = vmul.f32 10.0, %v3743_v23  ;;  %v3744_v8 = vsub.f32 %v3709_v40, %v3708_v30 }
 0x1bc   :  { %v1889_v19 = vpop.eup %1888  ;;  %1896 = vlog2.f32 %v1147_v15  ;;  %v1154_v63 = vadd.f32 %v1887_v11, %v1080_v17  ;;  %v499_v20 = vmul.f32 1.442695, %v437_v1  ;;  %v3749_v17 = vsub.f32 %v3714_v36, %v3713_v62 }
 0x1bd   :  { %v1891_v41 = vpop.eup %1890  ;;  %1898 = vpow2.f32 %v493_v47  ;;  %v1208_v25 = vmul.f32 0.6931472, %v1889_v19  ;;  %v1077_v56 = vpop.xlane.xlu0 %1076  ;;  %v1299_v32 = vmul.f32 10.0, %v3744_v8  ;;  %v3745_v47 = vld [vmem:[#allocation60_spill] sm:$0xff]  ;;  %v1305_v51 = vmul.f32 10.0, %v3753_v6 }
 0x1be   :  { %v1153_v39 = vadd.f32 %v1891_v41, %v1077_v56  ;;  %1900 = vlog2.f32 %v1154_v63  ;;  %v3747_v28 = vsub.f32 %v3745_v47, %v3746_v13  ;;  %v1306_v19 = vmul.f32 10.0, %v3749_v17  ;;  %v3750_v63 = vld [vmem:[#allocation62_spill] sm:$0xff]  ;;  %v3751_v41 = vld [vmem:[#allocation65_spill] sm:$0xff]  ;;  %v3763_v17 = vld [vmem:[#allocation71_spill] sm:$0xff] }
 0x1bf   :  { %1902 = vpow2.f32 %v491_v48  ;;  %v3127_v45 = vadd.f32 %v1304_v59, %v1208_v25  ;;  %v3752_v26 = vsub.f32 %v3750_v63, %v3751_v41  ;;  %v3758_v23 = vsub.f32 %v3724_v29, %v3723_v24 }
 0x1c0   :  { %v1893_v18 = vpop.eup %1892  ;;  %1904 = vlog2.f32 %v1153_v39  ;;  %v442_v42 = vmul.f32 10.0, %v3747_v28  ;;  %v3760_v28 = vld [vmem:[#allocation69_spill] sm:$0xff]  ;;  %v3764_v24 = vsub.f32 %v3762_v7, %v3763_v17 }
 0x1c1   :  { %v1206_v61 = vmul.f32 0.6931472, %v1893_v18  ;;  %v1895_v0 = vpop.eup %1894  ;;  %v1092_v33 = vpop.xlane.xlu2 %1091  ;;  %1906 = vpow2.f32 %v495_v27  ;;  %v440_v59 = vmul.f32 10.0, %v3752_v26  ;;  %v501_v18 = vmul.f32 1.442695, %v438_v38 }
 0x1c2   :  { %v1897_v22 = vpop.eup %1896  ;;  %v1158_v52 = vadd.f32 %v1895_v0, %v1092_v33  ;;  %1908 = vpow2.f32 %v503_v35  ;;  %v509_v62 = vmul.f32 1.442695, %v442_v42  ;;  %v3754_v35 = vsub.f32 %v3720_v43, %v3719_v5  ;;  %v3755_v0 = vld [vmem:[#allocation61_spill] sm:$0xff]  ;;  %v3759_v43 = vld [vmem:[#allocation66_spill] sm:$0xff] }
 0x1c3   :  { %v3129_v4 = vadd.f32 %v1303_v44, %v1206_v61  ;;  %v1899_v50 = vpop.eup %1898  ;;  %v1198_v15 = vmul.f32 0.6931472, %v1897_v22  ;;  %v1086_v11 = vpop.xlane.xlu1 %1085  ;;  %v1308_v38 = vmul.f32 10.0, %v3758_v23  ;;  %v3761_v42 = vsub.f32 %v3759_v43, %v3760_v28 }
 0x1c4   :  { %v1901_v48 = vpop.eup %1900  ;;  %1910 = vlog2.f32 %v1158_v52  ;;  %v1156_v30 = vadd.f32 %v1899_v50, %v1086_v11  ;;  %v1310_v61 = vmul.f32 10.0, %v3754_v35  ;;  %v505_v52 = vmul.f32 1.442695, %v440_v59 }
 0x1c5   :  { %v1903_v40 = vpop.eup %1902  ;;  %1912 = vpow2.f32 %v499_v20  ;;  %v1337_v21 = vadd.f32 %v1299_v32, %v1198_v15  ;;  %v1212_v1 = vmul.f32 0.6931472, %v1901_v48  ;;  %v1083_v25 = vpop.xlane.xlu0 %1082  ;;  %v3756_v20 = vld [vmem:[#allocation64_spill] sm:$0xff]  ;;  %v1389_v50 = vsel %vm1363_vm0, %v3084_v58, 0.0 }
 0x1c6   :  { %v1905_v56 = vpop.eup %1904  ;;  %v1155_v53 = vadd.f32 %v1903_v40, %v1083_v25  ;;  %1914 = vlog2.f32 %v1156_v30  ;;  %v3757_v33 = vsub.f32 %v3755_v0, %v3756_v20  ;;  %v445_v15 = vmul.f32 10.0, %v3761_v42 }
 0x1c7   :  { %v1387_v36 = vsel %vm1363_vm0, %v1337_v21, 0.0  ;;  %v1210_v44 = vmul.f32 0.6931472, %v1905_v56  ;;  %v3155_v27 = vadd.f32 %v1306_v19, %v1212_v1  ;;  %v1907_v39 = vpop.eup %1906  ;;  %v443_v29 = vmul.f32 10.0, %v3764_v24 }
 0x1c8   :  { %v441_v22 = vmul.f32 10.0, %v3757_v33  ;;  %v1388_v10 = vadd.f32 %v1387_v36, %v3094_v46  ;;  %1916 = vlog2.f32 %v1155_v53  ;;  %v1909_v2 = vpop.eup %1908  ;;  %v1391_v19 = vsel %vm1363_vm0, %v3110_v31, 0.0 }
 0x1c9   :  { %v1343_v8 = vadd.f32 %v1305_v51, %v1210_v44  ;;  %v1101_v32 = vpop.xlane.xlu2 %1100  ;;  %1918 = vpow2.f32 %v501_v18  ;;  %v1393_v1 = vsel %vm1363_vm0, %v3108_v60, 0.0  ;;  %v515_v18 = vmul.f32 1.442695, %v445_v15 }
 0x1ca   :  { %v1911_v5 = vpop.eup %1910  ;;  %v1390_v11 = vadd.f32 %v1389_v50, %v1388_v10  ;;  %v1161_v46 = vadd.f32 %v1909_v2, %v1101_v32  ;;  %1920 = vpow2.f32 %v509_v62  ;;  %v507_v26 = vmul.f32 1.442695, %v441_v22  ;;  %v3767_v50 = vld [vmem:[#allocation67_spill] sm:$0xff]  ;;  %v3768_v32 = vld [vmem:[#allocation70_spill] sm:$0xff] }
 0x1cb   :  { %v1913_v48 = vpop.eup %1912  ;;  %v1220_v58 = vmul.f32 0.6931472, %v1911_v5  ;;  %v1095_v30 = vpop.xlane.xlu1 %1094  ;;  %v511_v31 = vmul.f32 1.442695, %v443_v29  ;;  %v1395_v36 = vsel %vm1363_vm0, %v3129_v4, 0.0  ;;  %v3765_v22 = vsub.f32 %v3731_v34, %v3730_v49 }
 0x1cc   :  { %v1915_v40 = vpop.eup %1914  ;;  %v1392_v59 = vadd.f32 %v1391_v19, %v1390_v11  ;;  %1922 = vlog2.f32 %v1161_v46  ;;  %v1159_v21 = vadd.f32 %v1913_v48, %v1095_v30  ;;  %v3766_v2 = vsub.f32 %v3734_v54, %v3733_v14  ;;  %v3770_v11 = vld [vmem:[#allocation72_spill] sm:$0xff]  ;;  %v3771_v14 = vld [vmem:[#allocation75_spill] sm:$0xff] }
 0x1cd   :  { %1924 = vpow2.f32 %v505_v52  ;;  %v3179_v25 = vadd.f32 %v1310_v61, %v1220_v58  ;;  %v1216_v56 = vmul.f32 0.6931472, %v1915_v40  ;;  %v1089_v6 = vpop.xlane.xlu0 %1088  ;;  %v1309_v60 = vmul.f32 10.0, %v3765_v22  ;;  %v3774_v40 = vld [vmem:[#allocation74_spill] sm:$0xff] }
 0x1ce   :  { %v1917_v51 = vpop.eup %1916  ;;  %v1394_v53 = vadd.f32 %v1393_v1, %v1392_v59  ;;  %v1157_v62 = vadd.f32 %v1907_v39, %v1089_v6  ;;  %1926 = vlog2.f32 %v1159_v21  ;;  %v1313_v23 = vmul.f32 10.0, %v3766_v2 }
 0x1cf   :  { %v1214_v44 = vmul.f32 0.6931472, %v1917_v51  ;;  %v1346_v35 = vadd.f32 %v1308_v38, %v1216_v56  ;;  %v1919_v33 = vpop.eup %1918  ;;  %v1397_v39 = vsel %vm1363_vm0, %v3127_v45, 0.0  ;;  %v3769_v49 = vsub.f32 %v3767_v50, %v3768_v32 }
 0x1d0   :  { %v1396_v61 = vadd.f32 %v1395_v36, %v1394_v53  ;;  %1928 = vlog2.f32 %v1157_v62  ;;  %v1921_v10 = vpop.eup %1920  ;;  %v3772_v54 = vsub.f32 %v3770_v11, %v3771_v14  ;;  %v1399_v48 = vsel %vm1363_vm0, %v1343_v8, 0.0 }
 0x1d1   :  { %1930 = vpow2.f32 %v507_v26  ;;  %v1345_v4 = vadd.f32 %v3143_v12, %v1214_v44  ;;  %v1110_v52 = vpop.xlane.xlu2 %1109  ;;  %v444_v34 = vmul.f32 10.0, %v3769_v49  ;;  %v3773_v29 = vsub.f32 %v3738_v57, %v3737_v3  ;;  %v3775_v26 = vld [vmem:[#allocation77_spill] sm:$0xff] }
 0x1d2   :  { %v1923_v38 = vpop.eup %1922  ;;  %1932 = vpow2.f32 %v515_v18  ;;  %v1398_v5 = vadd.f32 %v1397_v39, %v1396_v61  ;;  %v1164_v42 = vadd.f32 %v1921_v10, %v1110_v52  ;;  %v448_v46 = vmul.f32 10.0, %v3772_v54 }
 0x1d3   :  { %v1925_v15 = vpop.eup %1924  ;;  %1934 = vpow2.f32 %v511_v31  ;;  %v1226_v45 = vmul.f32 0.6931472, %v1923_v38  ;;  %v1104_v24 = vpop.xlane.xlu1 %1103  ;;  %v1311_v19 = vmul.f32 10.0, %v3773_v29  ;;  %v3776_v59 = vsub.f32 %v3774_v40, %v3775_v26 }
 0x1d4   :  { %v1927_v12 = vpop.eup %1926  ;;  %v1400_v58 = vadd.f32 %v1399_v48, %v1398_v5  ;;  %1936 = vlog2.f32 %v1164_v42  ;;  %v1162_v30 = vadd.f32 %v1925_v15, %v1104_v24  ;;  %v1401_v1 = vsel %vm1363_vm0, %v3155_v27, 0.0 }
 0x1d5   :  { %v446_v21 = vmul.f32 10.0, %v3776_v59  ;;  %v3207_v56 = vadd.f32 %v1313_v23, %v1226_v45  ;;  %v1222_v8 = vmul.f32 0.6931472, %v1927_v12  ;;  %v1098_v6 = vpop.xlane.xlu0 %1097  ;;  %v513_v18 = vmul.f32 1.442695, %v444_v34 }
 0x1d6   :  { %v1929_v51 = vpop.eup %1928  ;;  %v1402_v53 = vadd.f32 %v1401_v1, %v1400_v58  ;;  %v1160_v62 = vadd.f32 %v1919_v33, %v1098_v6  ;;  %1938 = vlog2.f32 %v1162_v30  ;;  %v521_v57 = vmul.f32 1.442695, %v448_v46 }
 0x1d7   :  { %v1931_v3 = vpop.eup %1930  ;;  %v1403_v31 = vsel %vm1363_vm0, %v1345_v4, 0.0  ;;  %v1218_v36 = vmul.f32 0.6931472, %v1929_v51  ;;  %v1349_v44 = vadd.f32 %v1311_v19, %v1222_v8  ;;  %v517_v27 = vmul.f32 1.442695, %v446_v21 }
 0x1d8   :  { %v1933_v22 = vpop.eup %1932  ;;  %v1404_v61 = vadd.f32 %v1403_v31, %v1402_v53  ;;  %1940 = vlog2.f32 %v1160_v62  ;;  %v1405_v2 = vsel %vm1363_vm0, %v1346_v35, 0.0  ;;  %v3777_v49 = vsub.f32 %v3746_v13, %v3745_v47 }
 0x1d9   :  { %v1935_v10 = vpop.eup %1934  ;;  %v1347_v23 = vadd.f32 %v1309_v60, %v1218_v36  ;;  %v1119_v39 = vpop.xlane.xlu2 %1118  ;;  %1942 = vpow2.f32 %v513_v18  ;;  %v3778_v54 = vsub.f32 %v3751_v41, %v3750_v63  ;;  %v1409_v48 = vsel %vm1363_vm0, %v3179_v25, 0.0  ;;  %v3780_v63 = vld [vmem:[#allocation73_spill] sm:$0xff]  ;;  %v3781_v41 = vld [vmem:[#allocation76_spill] sm:$0xff] }
 0x1da   :  { %v1937_v52 = vpop.eup %1936  ;;  %v1406_v38 = vadd.f32 %v1405_v2, %v1404_v61  ;;  %v1167_v33 = vadd.f32 %v1933_v22, %v1119_v39  ;;  %v1316_v34 = vmul.f32 10.0, %v3777_v49  ;;  %1944 = vpow2.f32 %v521_v57 }
 0x1db   :  { %v1407_v4 = vsel %vm1363_vm0, %v1347_v23, 0.0  ;;  %v1232_v5 = vmul.f32 0.6931472, %v1937_v52  ;;  %v1113_v42 = vpop.xlane.xlu1 %1112  ;;  %v1314_v35 = vmul.f32 10.0, %v3778_v54  ;;  %v3779_v12 = vsub.f32 %v3742_v37, %v3741_v9 }
 0x1dc   :  { %v1939_v15 = vpop.eup %1938  ;;  %v1408_v60 = vadd.f32 %v1407_v4, %v1406_v38  ;;  %1946 = vlog2.f32 %v1167_v33  ;;  %v1165_v46 = vadd.f32 %v1935_v10, %v1113_v42  ;;  %v3782_v30 = vsub.f32 %v3780_v63, %v3781_v41 }
 0x1dd   :  { %1948 = vpow2.f32 %v517_v27  ;;  %v1354_v45 = vadd.f32 %v1316_v34, %v1232_v5  ;;  %v1228_v47 = vmul.f32 0.6931472, %v1939_v15  ;;  %v1107_v13 = vpop.xlane.xlu0 %1106  ;;  %v1312_v29 = vmul.f32 10.0, %v3779_v12 }
 0x1de   :  { %v1941_v24 = vpop.eup %1940  ;;  %v1410_v19 = vadd.f32 %v1409_v48, %v1408_v60  ;;  %v1163_v58 = vadd.f32 %v1931_v3, %v1107_v13  ;;  %1950 = vlog2.f32 %v1165_v46  ;;  %v447_v59 = vmul.f32 10.0, %v3782_v30 }
 0x1df   :  { %v1411_v21 = vsel %vm1363_vm0, %v1349_v44, 0.0  ;;  %v1224_v1 = vmul.f32 0.6931472, %v1941_v24  ;;  %v1352_v8 = vadd.f32 %v1314_v35, %v1228_v47  ;;  %v1943_v25 = vpop.eup %1942  ;;  %v3783_v3 = vsub.f32 %v3760_v28, %v3759_v43 }
 0x1e0   :  { %v1412_v6 = vadd.f32 %v1411_v21, %v1410_v19  ;;  %1952 = vlog2.f32 %v1163_v58  ;;  %v1945_v51 = vpop.eup %1944  ;;  %v519_v31 = vmul.f32 1.442695, %v447_v59  ;;  %v3784_v2 = vsub.f32 %v3763_v17, %v3762_v7 }
 0x1e1   :  { %v1350_v18 = vadd.f32 %v1312_v29, %v1224_v1  ;;  %v1128_v53 = vpop.xlane.xlu2 %1127  ;;  %v1319_v57 = vmul.f32 10.0, %v3783_v3  ;;  %v1415_v39 = vsel %vm1363_vm0, %v3207_v56, 0.0  ;;  %v3785_v33 = vsub.f32 %v3756_v20, %v3755_v0 }
 0x1e2   :  { %v1947_v62 = vpop.eup %1946  ;;  %v1170_v9 = vadd.f32 %v1945_v51, %v1128_v53  ;;  %v1317_v23 = vmul.f32 10.0, %v3784_v2  ;;  %v1417_v5 = vsel %vm1363_vm0, %v1352_v8, 0.0  ;;  %v3786_v54 = vsub.f32 %v3771_v14, %v3770_v11 }
 0x1e3   :  { %v1949_v37 = vpop.eup %1948  ;;  %v1413_v36 = vsel %vm1363_vm0, %v1350_v18, 0.0  ;;  %v1238_v22 = vmul.f32 0.6931472, %v1947_v62  ;;  %v1122_v44 = vpop.xlane.xlu1 %1121  ;;  %v1315_v49 = vmul.f32 10.0, %v3785_v33  ;;  %v3787_v47 = vsub.f32 %v3775_v26, %v3774_v40 }
 0x1e4   :  { %v1951_v61 = vpop.eup %1950  ;;  %v1414_v10 = vadd.f32 %v1413_v36, %v1412_v6  ;;  %1954 = vlog2.f32 %v1170_v9  ;;  %v1168_v27 = vadd.f32 %v1949_v37, %v1122_v44  ;;  %v1322_v35 = vmul.f32 10.0, %v3786_v54  ;;  %v3790_v9 = vld [vmem:[#allocation79_spill] sm:$0xff]  ;;  %v3792_v36 = vld [vmem:[#allocation78_spill] sm:$0xff] }
 0x1e5   :  { %v1357_v52 = vadd.f32 %v1319_v57, %v1238_v22  ;;  %v1234_v38 = vmul.f32 0.6931472, %v1951_v61  ;;  %v1116_v43 = vpop.xlane.xlu0 %1115  ;;  %v1320_v13 = vmul.f32 10.0, %v3787_v47  ;;  %v1421_v24 = vsel %vm1363_vm0, %v1354_v45, 0.0 }
 0x1e6   :  { %v1953_v28 = vpop.eup %1952  ;;  %v1416_v34 = vadd.f32 %v1415_v39, %v1414_v10  ;;  %v1166_v4 = vadd.f32 %v1943_v25, %v1116_v43  ;;  %1956 = vlog2.f32 %v1168_v27  ;;  %v3788_v11 = vsub.f32 %v3768_v32, %v3767_v50 }
 0x1e7   :  { %1958 = vpow2.f32 %v519_v31  ;;  %v1230_v42 = vmul.f32 0.6931472, %v1953_v28  ;;  %v1355_v7 = vadd.f32 %v1317_v23, %v1234_v38  ;;  %v1427_v6 = vsel %vm1363_vm0, %v1357_v52, 0.0 }
 0x1e8   :  { %v1418_v17 = vadd.f32 %v1417_v5, %v1416_v34  ;;  %1960 = vlog2.f32 %v1166_v4  ;;  %v1318_v14 = vmul.f32 10.0, %v3788_v11  ;;  %v3789_v53 = vsub.f32 %v3781_v41, %v3780_v63 }
 0x1e9   :  { %v1353_v15 = vadd.f32 %v1315_v49, %v1230_v42  ;;  %v1423_v21 = vsel %vm1363_vm0, %v1355_v7, 0.0  ;;  %v3791_v37 = vsub.f32 %v3790_v9, %v2780_v55  ;;  %v3793_v22 = vsub.f32 %v3792_v36, %v2771_v16 }
 0x1ea   :  { %v1955_v56 = vpop.eup %1954  ;;  %v1321_v62 = vmul.f32 10.0, %v3789_v53  ;;  %v3794_v49 = vsub.f32 %v2780_v55, %v3790_v9  ;;  %v3795_v42 = vsub.f32 %v2771_v16, %v3792_v36 }
 0x1eb   :  { %v1419_v60 = vsel %vm1363_vm0, %v1353_v15, 0.0  ;;  %v1244_v0 = vmul.f32 0.6931472, %v1955_v56  ;;  %v450_v3 = vmul.f32 10.0, %v3791_v37  ;;  %v449_v44 = vmul.f32 10.0, %v3793_v22 }
 0x1ec   :  { %v1957_v20 = vpop.eup %1956  ;;  %v1420_v46 = vadd.f32 %v1419_v60, %v1418_v17  ;;  %v1324_v34 = vmul.f32 10.0, %v3794_v49  ;;  %v1323_v7 = vmul.f32 10.0, %v3795_v42 }
 0x1ed   :  { %v1959_v48 = vpop.eup %1958  ;;  %v1360_v12 = vadd.f32 %v1322_v35, %v1244_v0  ;;  %v1240_v29 = vmul.f32 0.6931472, %v1957_v20  ;;  %v525_v10 = vmul.f32 1.442695, %v450_v3  ;;  %v523_v41 = vmul.f32 1.442695, %v449_v44 }
 0x1ee   :  { %v1961_v58 = vpop.eup %1960  ;;  %v1422_v30 = vadd.f32 %v1421_v24, %v1420_v46 }
 0x1ef   :  { %v1236_v1 = vmul.f32 0.6931472, %v1961_v58  ;;  %v1358_v8 = vadd.f32 %v1320_v13, %v1240_v29  ;;  %v1433_v63 = vsel %vm1363_vm0, %v1360_v12, 0.0 }
 0x1f0   :  { %v1125_v19 = vpop.xlane.xlu0 %1124  ;;  %v1424_v25 = vadd.f32 %v1423_v21, %v1422_v30 }
 0x1f1   :  { %v1169_v59 = vadd.f32 %v1959_v48, %v1125_v19  ;;  %v1356_v40 = vadd.f32 %v1318_v14, %v1236_v1  ;;  %v1429_v50 = vsel %vm1363_vm0, %v1358_v8, 0.0 }
 0x1f3   :  { %1962 = vlog2.f32 %v1169_v59  ;;  %v1425_v26 = vsel %vm1363_vm0, %v1356_v40, 0.0 }
 0x1f4   :  { %v1426_v45 = vadd.f32 %v1425_v26, %v1424_v25  ;;  %1964 = vpow2.f32 %v525_v10 }
 0x1f5   :  { %1966 = vpow2.f32 %v523_v41 }
 0x1f6   :  { %v1428_v18 = vadd.f32 %v1427_v6, %v1426_v45 }
 0x1f8   :  { %v1430_v57 = vadd.f32 %v1429_v50, %v1428_v18 }
 0x1f9   :  { %v1963_v51 = vpop.eup %1962 }
 0x1fa   :  { %v1242_v32 = vmul.f32 0.6931472, %v1963_v51  ;;  %v1965_v23 = vpop.eup %1964 }
 0x1fb   :  { %v1967_v38 = vpop.eup %1966 }
 0x1fc   :  { %v1359_v31 = vadd.f32 %v1321_v62, %v1242_v32 }
 0x1fe   :  { %v1431_v61 = vsel %vm1363_vm0, %v1359_v31, 0.0 }
 0x1ff   :  { %v1432_v27 = vadd.f32 %v1431_v61, %v1430_v57 }
 0x201   :  { %v1434_v2 = vadd.f32 %v1433_v63, %v1432_v27 }
 0x207   :  { %v1134_v39 = vpop.xlane.xlu0 %1133 }
 0x208   :  { %v1172_v52 = vadd.f32 %v1965_v23, %v1134_v39 }
 0x209   :  { %v1131_v43 = vpop.xlane.xlu1 %1130 }
 0x20a   :  { %1968 = vlog2.f32 %v1172_v52  ;;  %v1171_v28 = vadd.f32 %v1967_v38, %v1131_v43 }
 0x20c   :  { %1970 = vlog2.f32 %v1171_v28 }
 0x210   :  { %v1969_v33 = vpop.eup %1968 }
 0x211   :  { %v1248_v4 = vmul.f32 0.6931472, %v1969_v33 }
 0x212   :  { %v1971_v5 = vpop.eup %1970 }
 0x213   :  { %v1246_v17 = vmul.f32 0.6931472, %v1971_v5  ;;  %v1362_v15 = vadd.f32 %v1324_v34, %v1248_v4 }
 0x215   :  { %v1361_v56 = vadd.f32 %v1323_v7, %v1246_v17  ;;  %v1437_v60 = vsel %vm1363_vm0, %v1362_v15, 0.0 }
 0x217   :  { %v1435_v54 = vsel %vm1363_vm0, %v1361_v56, 0.0 }
 0x218   :  { %v1436_v35 = vadd.f32 %v1435_v54, %v1434_v2 }
 0x21a   :  { %v1438_v0 = vadd.f32 %v1437_v60, %v1436_v35 }
 0x21c   :  { %1439 = vadd.xlane.f32.xlu2 %v1438_v0 }
 0x28f   :  { %v1440_v20 = vpop.xlane.xlu2 %1439 }
 0x290   :  { %v1441_v46 = vrot.slane %v1440_v20, 4 }
 0x292   :  { %v1442_v55 = vadd.f32 %v1441_v46, %v1440_v20 }
 0x294   :  { %v1443_v48 = vrot.slane %v1442_v55, 2 }
 0x296   :  { %v1444_v47 = vadd.f32 %v1443_v48, %v1442_v55 }
 0x298   :  { %v1445_v13 = vrot.slane %v1444_v47, 1 }
 0x29a   :  { %v1446_v24 = vadd.f32 %v1445_v13, %v1444_v47 }
 0x29c   :  { %1563 = vpush %v1446_v24 }
 0x2cd   :  { %s1564_s28 = spop %1563 }
 0x2ce   :  { %v1448_v16 = vstv %s1564_s28 }
 0x2cf   :  { %1449 = vst [vmem:[#allocation5] sm:$0xff] %v1448_v16 }
 0x2d0   :  { %1460 = dma.vmem_to_hbm [thread:$0]  %s1456_s27, 128, %s1458_s25, [#allocation4]  }
 0x2d1   :  { %2022 = dma.done.wait [#allocation4], 128  }
 0x2d2   :  { %2023 = vsyncadd [#allocation4], 4294967168 }
 0x2d3   :  { %1465 = vsyncpa [#allocation3], 1 }
 0x2d4   :  { %1466 = vsyncpa [#allocation4], 1 }

</bundles_post_ra>
